<compile_context>
chip_gen: v7x
topology: tpu7x:2x2x1
jax: 0.10.0
libtpu: 0.0.40
codegen_flags: <defaults>
</compile_context>

<pallas_src>
import functools

import jax
import jax.numpy as jnp
from jax import lax
from jax.experimental import pallas as pl
from jax.experimental.pallas import tpu as pltpu

LMAX = 2.0      # normalize_A(..., lmax=2) default
BN_EPS = 1e-5   # nn.BatchNorm1d default eps

_mm = functools.partial(jnp.dot, preferred_element_type=jnp.float32,
                        precision=jax.lax.Precision.HIGHEST)


# ---------------------------------------------------------------------------
# Kernel 1: HierarchicalAttention (band SE + channel SE + flatten), fused.
# One grid step = one batch element; x block (1, C, F*NB) -> (C, F*NB) in VMEM.
# ---------------------------------------------------------------------------
def _hier_attention_kernel(x_ref, pool_ref, expand_ref,
                           bw1_ref, bb1_ref, bw2_ref, bb2_ref,
                           cw1_ref, cb1_ref, cw2_ref, cb2_ref,
                           o_ref):
    x = x_ref[0]                                               # (C, D), D = F * NB

    # ---- band squeeze-excitation (SELayer over the frequency-band axis) ----
    col_mean = jnp.mean(x, axis=0, keepdims=True)              # (1, D): mean over channels
    pooled_b = _mm(col_mean, pool_ref[...])                    # (1, NB): + mean over F
    h_b = jnp.maximum(_mm(pooled_b, bw1_ref[...]) + bb1_ref[...], 0.0)
    s_b = jax.nn.sigmoid(_mm(h_b, bw2_ref[...]) + bb2_ref[...])   # (1, NB)
    s_full = _mm(s_b, expand_ref[...])                         # (1, D): band scale per lane
    x = x * s_full

    # ---- channel squeeze-excitation (column orientation: no transposes) ----
    pooled_c = jnp.mean(x, axis=1, keepdims=True)              # (C, 1)
    h_c = jnp.maximum(_mm(cw1_ref[...], pooled_c) + cb1_ref[...], 0.0)   # (H2, 1)
    s_c = jax.nn.sigmoid(_mm(cw2_ref[...], h_c) + cb2_ref[...])          # (C, 1)

    # flatten(start_dim=2) already happened in the wrapper's (free) HBM reshape.
    o_ref[0] = (x * s_c).astype(o_ref.dtype)


def hierarchical_attention(x, att):
    """x: [B, C, F*NB] -> [B, C, F*NB] (band-SE + channel-SE scaled, flattened)."""
    B, C, D = x.shape
    full2d = lambda b: (0, 0)
    weights = (att["pool"], att["expand"],
               att["bw1"], att["bb1"], att["bw2"], att["bb2"],
               att["cw1"], att["cb1"], att["cw2"], att["cb2"])
    in_specs = [pl.BlockSpec((1, C, D), lambda b: (b, 0, 0))]
    in_specs += [pl.BlockSpec(w.shape, full2d) for w in weights]
    return pl.pallas_call(
        _hier_attention_kernel,
        out_shape=jax.ShapeDtypeStruct((B, C, D), jnp.float32),
        grid_spec=pltpu.PrefetchScalarGridSpec(
            num_scalar_prefetch=0,
            grid=(B,),
            in_specs=in_specs,
            out_specs=pl.BlockSpec((1, C, D), lambda b: (b, 0, 0)),
        ),
        compiler_params=pltpu.CompilerParams(dimension_semantics=("parallel",)),
    )(x, *weights)


# ---------------------------------------------------------------------------
# Kernel 2: one DGCNN step, fully fused per (adjacency, batch) grid point:
#   BN affine -> A@W -> normalize_A -> Chebyshev graph conv -> ReLU.
# ---------------------------------------------------------------------------
def _dgcnn_kernel(x_ref, adj_ref, w_ref, gamma_ref, beta_ref, cw_ref, o_ref):
    C = adj_ref.shape[2]
    K = cw_ref.shape[1]

    # Per-DGCNN BatchNorm1d affine; shared batch statistics applied in the wrapper.
    x = x_ref[0] * gamma_ref[0] + beta_ref[0]                  # (C, D)

    # A_weighted = A @ W
    aw = _mm(adj_ref[0, 0], w_ref[0])                          # (C, C)

    # normalize_A
    aw = jnp.maximum(aw, 0.0)                                  # relu
    rows = lax.broadcasted_iota(jnp.int32, (C, C), 0)
    cols = lax.broadcasted_iota(jnp.int32, (C, C), 1)
    eye = (rows == cols).astype(jnp.float32)
    aw = aw * (1.0 - eye)                                      # zero the diagonal
    # A^T via MXU (identity contraction) - avoids an in-kernel relayout/transpose.
    aw_t = lax.dot_general(eye, aw, dimension_numbers=(((1,), (1,)), ((), ())),
                           preferred_element_type=jnp.float32,
                           precision=jax.lax.Precision.HIGHEST)
    a_sym = aw + aw_t
    d_col = jnp.sum(a_sym, axis=1, keepdims=True)              # (C, 1)
    d_row = jnp.sum(a_sym, axis=0, keepdims=True)              # (1, C) (== d_col^T, symmetric)
    dinv_col = lax.rsqrt(d_col + 1e-10)
    dinv_row = lax.rsqrt(d_row + 1e-10)
    lap = eye - a_sym * dinv_col * dinv_row                    # I - D A D
    l_norm = (2.0 / LMAX) * lap - eye

    # Chebynet: support_0 = I, support_k = support_{k-1} @ Lnorm; out = relu(sum_k T_k x W_k)
    # TODO(synk): Chebynet/GraphConvolution sources were not provided in the spec; this
    # follows the standard SEED-DGCNN implementation (matrix-power supports, shared ReLU).
    acc = _mm(x, cw_ref[0, 0])                                 # k = 0: I @ x @ W_0
    t_k = l_norm
    for k in range(1, K):
        acc = acc + _mm(_mm(t_k, x), cw_ref[0, k])
        if k + 1 < K:
            t_k = _mm(t_k, l_norm)

    o_ref[0, 0] = jnp.maximum(acc, 0.0).astype(o_ref.dtype)


def dgcnn_stack(x_hat, adj_stack, dg):
    """x_hat: [B, C, D] (BN-normalized, no affine); adj_stack: [A, B, C, C].
    Returns [A, B, C, G]."""
    A, B, C, _ = adj_stack.shape
    D = x_hat.shape[-1]
    K = dg["cheb_w"].shape[1]
    G = dg["cheb_w"].shape[3]
    return pl.pallas_call(
        _dgcnn_kernel,
        out_shape=jax.ShapeDtypeStruct((A, B, C, G), jnp.float32),
        grid_spec=pltpu.PrefetchScalarGridSpec(
            num_scalar_prefetch=0,
            grid=(A, B),
            in_specs=[
                pl.BlockSpec((1, C, D), lambda a, b: (b, 0, 0)),        # x_hat
                pl.BlockSpec((1, 1, C, C), lambda a, b: (a, b, 0, 0)),  # adjacency
                pl.BlockSpec((1, C, C), lambda a, b: (a, 0, 0)),        # DGCNN.W
                pl.BlockSpec((1, 1, D), lambda a, b: (a, 0, 0)),        # BN gamma
                pl.BlockSpec((1, 1, D), lambda a, b: (a, 0, 0)),        # BN beta
                pl.BlockSpec((1, K, D, G), lambda a, b: (a, 0, 0, 0)),  # Chebynet weights
            ],
            out_specs=pl.BlockSpec((1, 1, C, G), lambda a, b: (a, b, 0, 0)),
        ),
        compiler_params=pltpu.CompilerParams(
            dimension_semantics=("parallel", "parallel")),
    )(x_hat, adj_stack, dg["W"], dg["gamma"], dg["beta"], dg["cheb_w"])


# ---------------------------------------------------------------------------
# FeatureExtractor.forward
# ---------------------------------------------------------------------------
def feature_extractor_forward(data, adjs, att, dg):
    """data: [B, C, F, NB]; adjs: [A, B, C, C] (pcc, nmi, coh, plv, gfk)."""
    B, C, F_, NB = data.shape
    x = data.reshape(B, C, F_ * NB)            # free metadata reshape (flatten happens here)
    x = hierarchical_attention(x, att)         # Pallas kernel 1
    # BatchNorm1d(feature_len) on x.transpose(1,2): training-mode batch statistics over
    # (batch, channel) per feature.  Identical for every DGCNN, so computed once in jnp;
    # the per-DGCNN affine (gamma, beta) is applied inside the DGCNN kernel.
    # TODO(synk): eval-mode (running-stats) BatchNorm and the args.bands != 5 band-select
    # branch are not implemented (demo uses training-mode stats and bands == 5).
    mean = jnp.mean(x, axis=(0, 1), keepdims=True)
    var = jnp.mean(jnp.square(x - mean), axis=(0, 1), keepdims=True)
    x_hat = (x - mean) * lax.rsqrt(var + BN_EPS)
    out = dgcnn_stack(x_hat, adjs, dg)         # Pallas kernel 2 -> [A, B, C, G]
    A, _, _, G = out.shape
    # matches torch.cat([r.reshape(B, -1) for r in results], dim=1)
    return jnp.transpose(out, (1, 0, 2, 3)).reshape(B, A * C * G)


# ---------------------------------------------------------------------------
# Parameter construction (SELayer / DGCNN weights in kernel-friendly layouts)
# ---------------------------------------------------------------------------
def init_params(key, *, C, F_, NB, A, K, G, se_ratio):
    D = F_ * NB
    H1 = max(NB // 2, 1)                       # band SE hidden (SELayer(bands, 2))
    red = max(C // se_ratio, 1)                # SELayer(channels_num, channels_num // ratio)
    H2 = max(C // red, 1)                      # channel SE hidden
    ks = jax.random.split(key, 6)
    eye_nb = jnp.eye(NB, dtype=jnp.float32)
    att = {
        # constant selectors: mean over F per band / broadcast band scale back to (F, NB)
        "pool": jnp.tile(eye_nb, (F_, 1)) / float(F_),          # (D, NB)
        "expand": jnp.tile(eye_nb, (1, F_)),                    # (NB, D)
        # band SE FC weights stored as (in, out) for row-oriented in-kernel matmuls
        "bw1": 0.3 * jax.random.normal(ks[0], (NB, H1), jnp.float32),
        "bb1": jnp.zeros((1, H1), jnp.float32),
        "bw2": 0.3 * jax.random.normal(ks[1], (H1, NB), jnp.float32),
        "bb2": jnp.zeros((1, NB), jnp.float32),
        # channel SE FC weights stored as (out, in) for column-oriented in-kernel matmuls
        "cw1": 0.2 * jax.random.normal(ks[2], (H2, C), jnp.float32),
        "cb1": jnp.zeros((H2, 1), jnp.float32),
        "cw2": 0.2 * jax.random.normal(ks[3], (C, H2), jnp.float32),
        "cb2": jnp.zeros((C, 1), jnp.float32),
    }
    dg = {
        "W": jax.random.uniform(ks[4], (A, C, C), jnp.float32, 0.01, 0.5),
        "gamma": jnp.ones((A, 1, D), jnp.float32),
        "beta": jnp.zeros((A, 1, D), jnp.float32),
        "cheb_w": jax.random.normal(ks[5], (A, K, D, G), jnp.float32) / jnp.sqrt(float(D)),
    }
    return att, dg


# ---------------------------------------------------------------------------
# Pure-jnp reference (for correctness check against the Pallas path)
# ---------------------------------------------------------------------------
def reference_forward(data, adjs, att, dg):
    B, C, F_, NB = data.shape
    A = adjs.shape[0]
    x = data
    pooled_b = jnp.mean(x, axis=(1, 2))                          # (B, NB)
    h_b = jax.nn.relu(pooled_b @ att["bw1"] + att["bb1"])
    s_b = jax.nn.sigmoid(h_b @ att["bw2"] + att["bb2"])
    x = x * s_b[:, None, None, :]
    pooled_c = jnp.mean(x, axis=(2, 3))                          # (B, C)
    h_c = jax.nn.relu(pooled_c @ att["cw1"].T + att["cb1"].T)
    s_c = jax.nn.sigmoid(h_c @ att["cw2"].T + att["cb2"].T)
    x = x * s_c[:, :, None, None]
    x = x.reshape(B, C, F_ * NB)

    mean = jnp.mean(x, axis=(0, 1), keepdims=True)
    var = jnp.mean(jnp.square(x - mean), axis=(0, 1), keepdims=True)
    x_hat = (x - mean) / jnp.sqrt(var + BN_EPS)

    eye = jnp.eye(C, dtype=jnp.float32)
    K = dg["cheb_w"].shape[1]
    outs = []
    for a in range(A):
        xb = x_hat * dg["gamma"][a] + dg["beta"][a]
        aw = jax.nn.relu(jnp.einsum("bij,jk->bik", adjs[a], dg["W"][a]))
        aw = aw * (1.0 - eye)
        aw = aw + jnp.swapaxes(aw, 1, 2)
        d = jnp.sum(aw, axis=2)
        dinv = 1.0 / jnp.sqrt(d + 1e-10)
        lap = eye - aw * dinv[:, :, None] * dinv[:, None, :]
        l_norm = 2.0 * lap / LMAX - eye
        res = jnp.einsum("bcd,dg->bcg", xb, dg["cheb_w"][a, 0])
        t_k = l_norm
        for k in range(1, K):
            res = res + jnp.einsum("bcd,dg->bcg",
                                   jnp.einsum("bij,bjd->bid", t_k, xb),
                                   dg["cheb_w"][a, k])
            if k + 1 < K:
                t_k = jnp.einsum("bij,bjk->bik", t_k, l_norm)
        outs.append(jax.nn.relu(res).reshape(B, -1))
    return jnp.concatenate(outs, axis=1)


if __name__ == "__main__":
    # Make the jnp reference use full-precision matmuls so it matches the f32 MXU
    # accumulation inside the kernels.
    jax.config.update("jax_default_matmul_precision", "highest")

    key = jax.random.PRNGKey(0)
    B, C, F_, NB = 2, 16, 8, 5        # batch, EEG channels, features per band, bands
    A, K, G = 5, 2, 8                 # adj_num, kadj (Chebyshev order), graph_out
    se_ratio = 4

    k_data, k_adj, k_gfk, k_par = jax.random.split(key, 4)
    data = jax.random.normal(k_data, (B, C, F_, NB), jnp.float32)

    # Four data-driven adjacencies (pcc, nmi, coh, plv): symmetric, non-negative.
    raw = jax.random.uniform(k_adj, (4, B, C, C), jnp.float32)
    data_adjs = 0.5 * (raw + jnp.swapaxes(raw, 2, 3))
    # TODO(synk): the original torch.load()s a spatial-distance adjacency from disk;
    # use a deterministic synthetic symmetric matrix broadcast over the batch instead.
    gfk = jax.random.uniform(k_gfk, (C, C), jnp.float32)
    gfk = 0.5 * (gfk + gfk.T)
    gfk = jnp.broadcast_to(gfk[None], (B, C, C))
    adjs = jnp.concatenate([data_adjs, gfk[None]], axis=0)      # [A, B, C, C]

    att, dg = init_params(k_par, C=C, F_=F_, NB=NB, A=A, K=K, G=G, se_ratio=se_ratio)

    fwd = jax.jit(feature_extractor_forward)
    out = jax.block_until_ready(fwd(data, adjs, att, dg))

    assert out.shape == (B, A * C * G), out.shape
    assert bool(jnp.all(jnp.isfinite(out))), "non-finite output"

    ref = reference_forward(data, adjs, att, dg)
    max_err = float(jnp.max(jnp.abs(out - ref)))
    assert max_err < 2e-3, f"kernel/reference mismatch: {max_err}"

    print("KERNEL_OK")
</pallas_src>

<mosaic_0001>
module attributes {stable_mosaic.version = 11 : i64} {
  func.func @_dgcnn_kernel(%arg0: i32, %arg1: i32, %arg2: memref<1x16x40xf32, #tpu.memory_space<vmem>>, %arg3: memref<1x1x16x16xf32, #tpu.memory_space<vmem>>, %arg4: memref<1x16x16xf32, #tpu.memory_space<vmem>>, %arg5: memref<1x1x40xf32, #tpu.memory_space<vmem>>, %arg6: memref<1x1x40xf32, #tpu.memory_space<vmem>>, %arg7: memref<1x2x40x8xf32, #tpu.memory_space<vmem>>, %arg8: memref<1x1x16x8xf32, #tpu.memory_space<vmem>>) attributes {dimension_semantics = [#tpu.dimension_semantics<parallel>, #tpu.dimension_semantics<parallel>], iteration_bounds = array<i64: 5, 2>, scalar_prefetch = 0 : i64, scratch_operands = 0 : i64, tpu.core_type = #tpu.core_type<tc>, window_params = [{transform_indices = @transform_0, window_bounds = array<i64: 1, 16, 40>}, {transform_indices = @transform_1, window_bounds = array<i64: 1, 1, 16, 16>}, {transform_indices = @transform_2, window_bounds = array<i64: 1, 16, 16>}, {transform_indices = @transform_3, window_bounds = array<i64: 1, 1, 40>}, {transform_indices = @transform_4, window_bounds = array<i64: 1, 1, 40>}, {transform_indices = @transform_5, window_bounds = array<i64: 1, 2, 40, 8>}, {transform_indices = @transform_6, window_bounds = array<i64: 1, 1, 16, 8>}]} {
    %c0 = arith.constant 0 : index
    %c0_0 = arith.constant 0 : index
    %c0_1 = arith.constant 0 : index
    %0 = vector.load %arg2[%c0, %c0_0, %c0_1] : memref<1x16x40xf32, #tpu.memory_space<vmem>>, vector<1x16x40xf32>
    %1 = vector.shape_cast %0 : vector<1x16x40xf32> to vector<16x40xf32>
    %c0_2 = arith.constant 0 : index
    %c0_3 = arith.constant 0 : index
    %c0_4 = arith.constant 0 : index
    %2 = vector.load %arg5[%c0_2, %c0_3, %c0_4] : memref<1x1x40xf32, #tpu.memory_space<vmem>>, vector<1x1x40xf32>
    %3 = vector.shape_cast %2 : vector<1x1x40xf32> to vector<1x40xf32>
    %4 = vector.broadcast %3 : vector<1x40xf32> to vector<16x40xf32>
    %5 = arith.mulf %1, %4 : vector<16x40xf32>
    %c0_5 = arith.constant 0 : index
    %c0_6 = arith.constant 0 : index
    %c0_7 = arith.constant 0 : index
    %6 = vector.load %arg6[%c0_5, %c0_6, %c0_7] : memref<1x1x40xf32, #tpu.memory_space<vmem>>, vector<1x1x40xf32>
    %7 = vector.shape_cast %6 : vector<1x1x40xf32> to vector<1x40xf32>
    %8 = vector.broadcast %7 : vector<1x40xf32> to vector<16x40xf32>
    %9 = arith.addf %5, %8 : vector<16x40xf32>
    %c0_8 = arith.constant 0 : index
    %c0_9 = arith.constant 0 : index
    %c0_10 = arith.constant 0 : index
    %c0_11 = arith.constant 0 : index
    %10 = vector.load %arg3[%c0_8, %c0_9, %c0_10, %c0_11] : memref<1x1x16x16xf32, #tpu.memory_space<vmem>>, vector<1x1x16x16xf32>
    %11 = vector.shape_cast %10 : vector<1x1x16x16xf32> to vector<16x16xf32>
    %c0_12 = arith.constant 0 : index
    %c0_13 = arith.constant 0 : index
    %c0_14 = arith.constant 0 : index
    %12 = vector.load %arg4[%c0_12, %c0_13, %c0_14] : memref<1x16x16xf32, #tpu.memory_space<vmem>>, vector<1x16x16xf32>
    %13 = vector.shape_cast %12 : vector<1x16x16xf32> to vector<16x16xf32>
    %cst = arith.constant dense<0.000000e+00> : vector<16x16xf32>
    %14 = tpu.matmul %11, %13, %cst {dimension_numbers = #tpu.dot_dimension_numbers<[1], [0], [0], [1], [0, 0, 1, 1], [], []>, precision = #tpu.contract_precision<fp32>} : vector<16x16xf32>, vector<16x16xf32>, vector<16x16xf32> -> vector<16x16xf32>
    %cst_15 = arith.constant 0.000000e+00 : f32
    %15 = vector.broadcast %cst_15 : f32 to vector<16x16xf32>
    %16 = arith.maximumf %14, %15 : vector<16x16xf32>
    %17 = tpu.iota {dimensions = array<i32: 0>} : vector<16x16xi32>
    %18 = tpu.iota {dimensions = array<i32: 1>} : vector<16x16xi32>
    %19 = arith.cmpi eq, %17, %18 : vector<16x16xi32>
    %20 = arith.extui %19 : vector<16x16xi1> to vector<16x16xi32>
    %21 = arith.sitofp %20 : vector<16x16xi32> to vector<16x16xf32>
    %cst_16 = arith.constant 1.000000e+00 : f32
    %22 = vector.broadcast %cst_16 : f32 to vector<16x16xf32>
    %23 = arith.subf %22, %21 : vector<16x16xf32>
    %24 = arith.mulf %16, %23 : vector<16x16xf32>
    %cst_17 = arith.constant dense<0.000000e+00> : vector<16x16xf32>
    %25 = tpu.matmul %21, %24, %cst_17 {dimension_numbers = #tpu.dot_dimension_numbers<[1], [1], [0], [0], [0, 0, 1, 0], [], []>, precision = #tpu.contract_precision<fp32>} : vector<16x16xf32>, vector<16x16xf32>, vector<16x16xf32> -> vector<16x16xf32>
    %26 = arith.addf %24, %25 : vector<16x16xf32>
    %cst_18 = arith.constant dense<0.000000e+00> : vector<16xf32>
    %27 = vector.multi_reduction <add>, %26, %cst_18 [1] : vector<16x16xf32> to vector<16xf32>
    %28 = vector.shape_cast %27 : vector<16xf32> to vector<16x1xf32>
    %cst_19 = arith.constant dense<0.000000e+00> : vector<16xf32>
    %29 = vector.multi_reduction <add>, %26, %cst_19 [0] : vector<16x16xf32> to vector<16xf32>
    %30 = vector.shape_cast %29 : vector<16xf32> to vector<1x16xf32>
    %cst_20 = arith.constant 1.000000e-10 : f32
    %31 = vector.broadcast %cst_20 : f32 to vector<16x1xf32>
    %32 = arith.addf %28, %31 : vector<16x1xf32>
    %33 = math.rsqrt %32 : vector<16x1xf32>
    %cst_21 = arith.constant 1.000000e-10 : f32
    %34 = vector.broadcast %cst_21 : f32 to vector<1x16xf32>
    %35 = arith.addf %30, %34 : vector<1x16xf32>
    %36 = math.rsqrt %35 : vector<1x16xf32>
    %37 = vector.broadcast %33 : vector<16x1xf32> to vector<16x16xf32>
    %38 = arith.mulf %26, %37 : vector<16x16xf32>
    %39 = vector.broadcast %36 : vector<1x16xf32> to vector<16x16xf32>
    %40 = arith.mulf %38, %39 : vector<16x16xf32>
    %41 = arith.subf %21, %40 : vector<16x16xf32>
    %cst_22 = arith.constant 1.000000e+00 : f32
    %42 = vector.broadcast %cst_22 : f32 to vector<16x16xf32>
    %43 = arith.mulf %42, %41 : vector<16x16xf32>
    %44 = arith.subf %43, %21 : vector<16x16xf32>
    %c0_23 = arith.constant 0 : index
    %c0_24 = arith.constant 0 : index
    %c0_25 = arith.constant 0 : index
    %c0_26 = arith.constant 0 : index
    %45 = vector.load %arg7[%c0_23, %c0_24, %c0_25, %c0_26] : memref<1x2x40x8xf32, #tpu.memory_space<vmem>>, vector<1x1x40x8xf32>
    %46 = vector.shape_cast %45 : vector<1x1x40x8xf32> to vector<40x8xf32>
    %cst_27 = arith.constant dense<0.000000e+00> : vector<16x8xf32>
    %47 = tpu.matmul %9, %46, %cst_27 {dimension_numbers = #tpu.dot_dimension_numbers<[1], [0], [0], [1], [0, 0, 1, 1], [], []>, precision = #tpu.contract_precision<fp32>} : vector<16x40xf32>, vector<40x8xf32>, vector<16x8xf32> -> vector<16x8xf32>
    %cst_28 = arith.constant dense<0.000000e+00> : vector<16x40xf32>
    %48 = tpu.matmul %44, %9, %cst_28 {dimension_numbers = #tpu.dot_dimension_numbers<[1], [0], [0], [1], [0, 0, 1, 1], [], []>, precision = #tpu.contract_precision<fp32>} : vector<16x16xf32>, vector<16x40xf32>, vector<16x40xf32> -> vector<16x40xf32>
    %c0_29 = arith.constant 0 : index
    %c1 = arith.constant 1 : index
    %c0_30 = arith.constant 0 : index
    %c0_31 = arith.constant 0 : index
    %49 = vector.load %arg7[%c0_29, %c1, %c0_30, %c0_31] : memref<1x2x40x8xf32, #tpu.memory_space<vmem>>, vector<1x1x40x8xf32>
    %50 = vector.shape_cast %49 : vector<1x1x40x8xf32> to vector<40x8xf32>
    %cst_32 = arith.constant dense<0.000000e+00> : vector<16x8xf32>
    %51 = tpu.matmul %48, %50, %cst_32 {dimension_numbers = #tpu.dot_dimension_numbers<[1], [0], [0], [1], [0, 0, 1, 1], [], []>, precision = #tpu.contract_precision<fp32>} : vector<16x40xf32>, vector<40x8xf32>, vector<16x8xf32> -> vector<16x8xf32>
    %52 = arith.addf %47, %51 : vector<16x8xf32>
    %cst_33 = arith.constant 0.000000e+00 : f32
    %53 = vector.broadcast %cst_33 : f32 to vector<16x8xf32>
    %54 = arith.maximumf %52, %53 : vector<16x8xf32>
    %c0_34 = arith.constant 0 : index
    %c0_35 = arith.constant 0 : index
    %c0_36 = arith.constant 0 : index
    %c0_37 = arith.constant 0 : index
    %55 = vector.load %arg8[%c0_34, %c0_35, %c0_36, %c0_37] : memref<1x1x16x8xf32, #tpu.memory_space<vmem>>, vector<1x1x16x8xf32>
    %56 = vector.shape_cast %55 : vector<1x1x16x8xf32> to vector<16x8xf32>
    %57 = vector.shape_cast %54 : vector<16x8xf32> to vector<1x1x16x8xf32>
    tpu.vector_store %arg8[%c0_34, %c0_35, %c0_36, %c0_37], %57 {strides = array<i32>} : memref<1x1x16x8xf32, #tpu.memory_space<vmem>>, vector<1x1x16x8xf32>,
    return
  }
  func.func @transform_0(%arg0: i32, %arg1: i32) -> (i32, i32, i32) {
    %c0_i32 = arith.constant 0 : i32
    %c0_i32_0 = arith.constant 0 : i32
    %c0_i32_1 = arith.constant 0 : i32
    return %arg1, %c0_i32, %c0_i32_0 : i32, i32, i32
  }
  func.func @transform_1(%arg0: i32, %arg1: i32) -> (i32, i32, i32, i32) {
    %c0_i32 = arith.constant 0 : i32
    %c0_i32_0 = arith.constant 0 : i32
    %c0_i32_1 = arith.constant 0 : i32
    return %arg0, %arg1, %c0_i32, %c0_i32_0 : i32, i32, i32, i32
  }
  func.func @transform_2(%arg0: i32, %arg1: i32) -> (i32, i32, i32) {
    %c0_i32 = arith.constant 0 : i32
    %c0_i32_0 = arith.constant 0 : i32
    %c0_i32_1 = arith.constant 0 : i32
    return %arg0, %c0_i32, %c0_i32_0 : i32, i32, i32
  }
  func.func @transform_3(%arg0: i32, %arg1: i32) -> (i32, i32, i32) {
    %c0_i32 = arith.constant 0 : i32
    %c0_i32_0 = arith.constant 0 : i32
    %c0_i32_1 = arith.constant 0 : i32
    return %arg0, %c0_i32, %c0_i32_0 : i32, i32, i32
  }
  func.func @transform_4(%arg0: i32, %arg1: i32) -> (i32, i32, i32) {
    %c0_i32 = arith.constant 0 : i32
    %c0_i32_0 = arith.constant 0 : i32
    %c0_i32_1 = arith.constant 0 : i32
    return %arg0, %c0_i32, %c0_i32_0 : i32, i32, i32
  }
  func.func @transform_5(%arg0: i32, %arg1: i32) -> (i32, i32, i32, i32) {
    %c0_i32 = arith.constant 0 : i32
    %c0_i32_0 = arith.constant 0 : i32
    %c0_i32_1 = arith.constant 0 : i32
    %c0_i32_2 = arith.constant 0 : i32
    return %arg0, %c0_i32, %c0_i32_0, %c0_i32_1 : i32, i32, i32, i32
  }
  func.func @transform_6(%arg0: i32, %arg1: i32) -> (i32, i32, i32, i32) {
    %c0_i32 = arith.constant 0 : i32
    %c0_i32_0 = arith.constant 0 : i32
    %c0_i32_1 = arith.constant 0 : i32
    return %arg0, %arg1, %c0_i32, %c0_i32_0 : i32, i32, i32, i32
  }
}

module attributes {stable_mosaic.version = 11 : i64} {
  func.func @_hier_attention_kernel(%arg0: i32, %arg1: memref<1x16x40xf32, #tpu.memory_space<vmem>>, %arg2: memref<40x5xf32, #tpu.memory_space<vmem>>, %arg3: memref<5x40xf32, #tpu.memory_space<vmem>>, %arg4: memref<5x2xf32, #tpu.memory_space<vmem>>, %arg5: memref<1x2xf32, #tpu.memory_space<vmem>>, %arg6: memref<2x5xf32, #tpu.memory_space<vmem>>, %arg7: memref<1x5xf32, #tpu.memory_space<vmem>>, %arg8: memref<4x16xf32, #tpu.memory_space<vmem>>, %arg9: memref<4x1xf32, #tpu.memory_space<vmem>>, %arg10: memref<16x4xf32, #tpu.memory_space<vmem>>, %arg11: memref<16x1xf32, #tpu.memory_space<vmem>>, %arg12: memref<1x16x40xf32, #tpu.memory_space<vmem>>) attributes {dimension_semantics = [#tpu.dimension_semantics<parallel>], iteration_bounds = array<i64: 2>, scalar_prefetch = 0 : i64, scratch_operands = 0 : i64, tpu.core_type = #tpu.core_type<tc>, window_params = [{transform_indices = @transform_0, window_bounds = array<i64: 1, 16, 40>}, {pipeline_mode = #tpu.pipeline_mode<synchronous>, transform_indices = @transform_1, window_bounds = array<i64: 40, 5>}, {pipeline_mode = #tpu.pipeline_mode<synchronous>, transform_indices = @transform_2, window_bounds = array<i64: 5, 40>}, {pipeline_mode = #tpu.pipeline_mode<synchronous>, transform_indices = @transform_3, window_bounds = array<i64: 5, 2>}, {pipeline_mode = #tpu.pipeline_mode<synchronous>, transform_indices = @transform_4, window_bounds = array<i64: 1, 2>}, {pipeline_mode = #tpu.pipeline_mode<synchronous>, transform_indices = @transform_5, window_bounds = array<i64: 2, 5>}, {pipeline_mode = #tpu.pipeline_mode<synchronous>, transform_indices = @transform_6, window_bounds = array<i64: 1, 5>}, {pipeline_mode = #tpu.pipeline_mode<synchronous>, transform_indices = @transform_7, window_bounds = array<i64: 4, 16>}, {pipeline_mode = #tpu.pipeline_mode<synchronous>, transform_indices = @transform_8, window_bounds = array<i64: 4, 1>}, {pipeline_mode = #tpu.pipeline_mode<synchronous>, transform_indices = @transform_9, window_bounds = array<i64: 16, 4>}, {pipeline_mode = #tpu.pipeline_mode<synchronous>, transform_indices = @transform_10, window_bounds = array<i64: 16, 1>}, {transform_indices = @transform_11, window_bounds = array<i64: 1, 16, 40>}]} {
    %c0 = arith.constant 0 : index
    %c0_0 = arith.constant 0 : index
    %c0_1 = arith.constant 0 : index
    %0 = vector.load %arg1[%c0, %c0_0, %c0_1] : memref<1x16x40xf32, #tpu.memory_space<vmem>>, vector<1x16x40xf32>
    %1 = vector.shape_cast %0 : vector<1x16x40xf32> to vector<16x40xf32>
    %cst = arith.constant dense<0.000000e+00> : vector<40xf32>
    %2 = vector.multi_reduction <add>, %1, %cst [0] : vector<16x40xf32> to vector<40xf32>
    %3 = vector.shape_cast %2 : vector<40xf32> to vector<1x40xf32>
    %cst_2 = arith.constant 1.600000e+01 : f32
    %4 = vector.broadcast %cst_2 : f32 to vector<1x40xf32>
    %5 = arith.divf %3, %4 : vector<1x40xf32>
    %c0_3 = arith.constant 0 : index
    %c0_4 = arith.constant 0 : index
    %6 = vector.load %arg2[%c0_3, %c0_4] : memref<40x5xf32, #tpu.memory_space<vmem>>, vector<40x5xf32>
    %cst_5 = arith.constant dense<0.000000e+00> : vector<1x5xf32>
    %7 = tpu.matmul %5, %6, %cst_5 {dimension_numbers = #tpu.dot_dimension_numbers<[1], [0], [0], [1], [0, 0, 1, 1], [], []>, precision = #tpu.contract_precision<fp32>} : vector<1x40xf32>, vector<40x5xf32>, vector<1x5xf32> -> vector<1x5xf32>
    %c0_6 = arith.constant 0 : index
    %c0_7 = arith.constant 0 : index
    %8 = vector.load %arg4[%c0_6, %c0_7] : memref<5x2xf32, #tpu.memory_space<vmem>>, vector<5x2xf32>
    %cst_8 = arith.constant dense<0.000000e+00> : vector<1x2xf32>
    %9 = tpu.matmul %7, %8, %cst_8 {dimension_numbers = #tpu.dot_dimension_numbers<[1], [0], [0], [1], [0, 0, 1, 1], [], []>, precision = #tpu.contract_precision<fp32>} : vector<1x5xf32>, vector<5x2xf32>, vector<1x2xf32> -> vector<1x2xf32>
    %c0_9 = arith.constant 0 : index
    %c0_10 = arith.constant 0 : index
    %10 = vector.load %arg5[%c0_9, %c0_10] : memref<1x2xf32, #tpu.memory_space<vmem>>, vector<1x2xf32>
    %11 = arith.addf %9, %10 : vector<1x2xf32>
    %cst_11 = arith.constant 0.000000e+00 : f32
    %12 = vector.broadcast %cst_11 : f32 to vector<1x2xf32>
    %13 = arith.maximumf %11, %12 : vector<1x2xf32>
    %c0_12 = arith.constant 0 : index
    %c0_13 = arith.constant 0 : index
    %14 = vector.load %arg6[%c0_12, %c0_13] : memref<2x5xf32, #tpu.memory_space<vmem>>, vector<2x5xf32>
    %cst_14 = arith.constant dense<0.000000e+00> : vector<1x5xf32>
    %15 = tpu.matmul %13, %14, %cst_14 {dimension_numbers = #tpu.dot_dimension_numbers<[1], [0], [0], [1], [0, 0, 1, 1], [], []>, precision = #tpu.contract_precision<fp32>} : vector<1x2xf32>, vector<2x5xf32>, vector<1x5xf32> -> vector<1x5xf32>
    %c0_15 = arith.constant 0 : index
    %c0_16 = arith.constant 0 : index
    %16 = vector.load %arg7[%c0_15, %c0_16] : memref<1x5xf32, #tpu.memory_space<vmem>>, vector<1x5xf32>
    %17 = arith.addf %15, %16 : vector<1x5xf32>
    %18 = arith.negf %17 : vector<1x5xf32>
    %19 = math.exp %18 : vector<1x5xf32>
    %cst_17 = arith.constant 1.000000e+00 : f32
    %20 = vector.broadcast %cst_17 : f32 to vector<1x5xf32>
    %21 = arith.addf %20, %19 : vector<1x5xf32>
    %22 = arith.divf %20, %21 : vector<1x5xf32>
    %c0_18 = arith.constant 0 : index
    %c0_19 = arith.constant 0 : index
    %23 = vector.load %arg3[%c0_18, %c0_19] : memref<5x40xf32, #tpu.memory_space<vmem>>, vector<5x40xf32>
    %cst_20 = arith.constant dense<0.000000e+00> : vector<1x40xf32>
    %24 = tpu.matmul %22, %23, %cst_20 {dimension_numbers = #tpu.dot_dimension_numbers<[1], [0], [0], [1], [0, 0, 1, 1], [], []>, precision = #tpu.contract_precision<fp32>} : vector<1x5xf32>, vector<5x40xf32>, vector<1x40xf32> -> vector<1x40xf32>
    %25 = vector.broadcast %24 : vector<1x40xf32> to vector<16x40xf32>
    %26 = arith.mulf %1, %25 : vector<16x40xf32>
    %cst_21 = arith.constant dense<0.000000e+00> : vector<16xf32>
    %27 = vector.multi_reduction <add>, %26, %cst_21 [1] : vector<16x40xf32> to vector<16xf32>
    %28 = vector.shape_cast %27 : vector<16xf32> to vector<16x1xf32>
    %cst_22 = arith.constant 4.000000e+01 : f32
    %29 = vector.broadcast %cst_22 : f32 to vector<16x1xf32>
    %30 = arith.divf %28, %29 : vector<16x1xf32>
    %c0_23 = arith.constant 0 : index
    %c0_24 = arith.constant 0 : index
    %31 = vector.load %arg8[%c0_23, %c0_24] : memref<4x16xf32, #tpu.memory_space<vmem>>, vector<4x16xf32>
    %cst_25 = arith.constant dense<0.000000e+00> : vector<4x1xf32>
    %32 = tpu.matmul %31, %30, %cst_25 {dimension_numbers = #tpu.dot_dimension_numbers<[1], [0], [0], [1], [0, 0, 1, 1], [], []>, precision = #tpu.contract_precision<fp32>} : vector<4x16xf32>, vector<16x1xf32>, vector<4x1xf32> -> vector<4x1xf32>
    %c0_26 = arith.constant 0 : index
    %c0_27 = arith.constant 0 : index
    %33 = vector.load %arg9[%c0_26, %c0_27] : memref<4x1xf32, #tpu.memory_space<vmem>>, vector<4x1xf32>
    %34 = arith.addf %32, %33 : vector<4x1xf32>
    %cst_28 = arith.constant 0.000000e+00 : f32
    %35 = vector.broadcast %cst_28 : f32 to vector<4x1xf32>
    %36 = arith.maximumf %34, %35 : vector<4x1xf32>
    %c0_29 = arith.constant 0 : index
    %c0_30 = arith.constant 0 : index
    %37 = vector.load %arg10[%c0_29, %c0_30] : memref<16x4xf32, #tpu.memory_space<vmem>>, vector<16x4xf32>
    %cst_31 = arith.constant dense<0.000000e+00> : vector<16x1xf32>
    %38 = tpu.matmul %37, %36, %cst_31 {dimension_numbers = #tpu.dot_dimension_numbers<[1], [0], [0], [1], [0, 0, 1, 1], [], []>, precision = #tpu.contract_precision<fp32>} : vector<16x4xf32>, vector<4x1xf32>, vector<16x1xf32> -> vector<16x1xf32>
    %c0_32 = arith.constant 0 : index
    %c0_33 = arith.constant 0 : index
    %39 = vector.load %arg11[%c0_32, %c0_33] : memref<16x1xf32, #tpu.memory_space<vmem>>, vector<16x1xf32>
    %40 = arith.addf %38, %39 : vector<16x1xf32>
    %41 = arith.negf %40 : vector<16x1xf32>
    %42 = math.exp %41 : vector<16x1xf32>
    %cst_34 = arith.constant 1.000000e+00 : f32
    %43 = vector.broadcast %cst_34 : f32 to vector<16x1xf32>
    %44 = arith.addf %43, %42 : vector<16x1xf32>
    %45 = arith.divf %43, %44 : vector<16x1xf32>
    %46 = vector.broadcast %45 : vector<16x1xf32> to vector<16x40xf32>
    %47 = arith.mulf %26, %46 : vector<16x40xf32>
    %c0_35 = arith.constant 0 : index
    %c0_36 = arith.constant 0 : index
    %c0_37 = arith.constant 0 : index
    %48 = vector.load %arg12[%c0_35, %c0_36, %c0_37] : memref<1x16x40xf32, #tpu.memory_space<vmem>>, vector<1x16x40xf32>
    %49 = vector.shape_cast %48 : vector<1x16x40xf32> to vector<16x40xf32>
    %50 = vector.shape_cast %47 : vector<16x40xf32> to vector<1x16x40xf32>
    tpu.vector_store %arg12[%c0_35, %c0_36, %c0_37], %50 {strides = array<i32>} : memref<1x16x40xf32, #tpu.memory_space<vmem>>, vector<1x16x40xf32>,
    return
  }
  func.func @transform_0(%arg0: i32) -> (i32, i32, i32) {
    %c0_i32 = arith.constant 0 : i32
    %c0_i32_0 = arith.constant 0 : i32
    %c0_i32_1 = arith.constant 0 : i32
    return %arg0, %c0_i32, %c0_i32_0 : i32, i32, i32
  }
  func.func @transform_1(%arg0: i32) -> (i32, i32) {
    %c0_i32 = arith.constant 0 : i32
    %c0_i32_0 = arith.constant 0 : i32
    %c0_i32_1 = arith.constant 0 : i32
    return %c0_i32, %c0_i32_0 : i32, i32
  }
  func.func @transform_2(%arg0: i32) -> (i32, i32) {
    %c0_i32 = arith.constant 0 : i32
    %c0_i32_0 = arith.constant 0 : i32
    %c0_i32_1 = arith.constant 0 : i32
    return %c0_i32, %c0_i32_0 : i32, i32
  }
  func.func @transform_3(%arg0: i32) -> (i32, i32) {
    %c0_i32 = arith.constant 0 : i32
    %c0_i32_0 = arith.constant 0 : i32
    %c0_i32_1 = arith.constant 0 : i32
    return %c0_i32, %c0_i32_0 : i32, i32
  }
  func.func @transform_4(%arg0: i32) -> (i32, i32) {
    %c0_i32 = arith.constant 0 : i32
    %c0_i32_0 = arith.constant 0 : i32
    %c0_i32_1 = arith.constant 0 : i32
    return %c0_i32, %c0_i32_0 : i32, i32
  }
  func.func @transform_5(%arg0: i32) -> (i32, i32) {
    %c0_i32 = arith.constant 0 : i32
    %c0_i32_0 = arith.constant 0 : i32
    %c0_i32_1 = arith.constant 0 : i32
    return %c0_i32, %c0_i32_0 : i32, i32
  }
  func.func @transform_6(%arg0: i32) -> (i32, i32) {
    %c0_i32 = arith.constant 0 : i32
    %c0_i32_0 = arith.constant 0 : i32
    %c0_i32_1 = arith.constant 0 : i32
    return %c0_i32, %c0_i32_0 : i32, i32
  }
  func.func @transform_7(%arg0: i32) -> (i32, i32) {
    %c0_i32 = arith.constant 0 : i32
    %c0_i32_0 = arith.constant 0 : i32
    %c0_i32_1 = arith.constant 0 : i32
    return %c0_i32, %c0_i32_0 : i32, i32
  }
  func.func @transform_8(%arg0: i32) -> (i32, i32) {
    %c0_i32 = arith.constant 0 : i32
    %c0_i32_0 = arith.constant 0 : i32
    %c0_i32_1 = arith.constant 0 : i32
    return %c0_i32, %c0_i32_0 : i32, i32
  }
  func.func @transform_9(%arg0: i32) -> (i32, i32) {
    %c0_i32 = arith.constant 0 : i32
    %c0_i32_0 = arith.constant 0 : i32
    %c0_i32_1 = arith.constant 0 : i32
    return %c0_i32, %c0_i32_0 : i32, i32
  }
  func.func @transform_10(%arg0: i32) -> (i32, i32) {
    %c0_i32 = arith.constant 0 : i32
    %c0_i32_0 = arith.constant 0 : i32
    %c0_i32_1 = arith.constant 0 : i32
    return %c0_i32, %c0_i32_0 : i32, i32
  }
  func.func @transform_11(%arg0: i32) -> (i32, i32, i32) {
    %c0_i32 = arith.constant 0 : i32
    %c0_i32_0 = arith.constant 0 : i32
    %c0_i32_1 = arith.constant 0 : i32
    return %arg0, %c0_i32, %c0_i32_0 : i32, i32, i32
  }
}

</mosaic_0001>

<bundles_post_ra>
// kernel: feature_extractor_forward.3
= control target key start
LH: loop header
LB: loop body
LE: loop exit
PB: predicated region body
PF: predicated region fallthrough
CT: control target
= control target key end

     0   :  { %s4054_s21 = smov 0   ;;  %s4056_s22 = smov 0   ;;  %s4297_s0 = inlined_call_operand.vmem [shape: f32[2,16,40], index: 0, kind: input, shape index: {}]   ;;  %s4298_s1 = inlined_call_operand.vmem [shape: f32[5,2,16,16], index: 1, kind: input, shape index: {}]   ;;  %s4299_s2 = inlined_call_operand.vmem [shape: f32[5,16,16], index: 2, kind: input, shape index: {}]   ;;  %s4300_s3 = inlined_call_operand.vmem [shape: f32[5,1,40], index: 3, kind: input, shape index: {}]   ;;  %s4301_s4 = inlined_call_operand.vmem [shape: f32[5,1,40], index: 4, kind: input, shape index: {}]   ;;  %s4302_s5 = inlined_call_operand.vmem [shape: f32[5,2,40,8], index: 5, kind: input, shape index: {}]   ;;  %s4303_s6 = inlined_call_operand.vmem [shape: f32[5,2,16,8], index: 6, kind: output, shape index: {}]  }
   0x1   :  { %s4058_s23 = smov 0   ;;  %s4060_s24 = smov 0  }
   0x2   :  { %s4062_s25 = smov 0  }
   0x3 LB: > { %s25_s26 = sadd.s32 1, %s4008_s23  ;;  %s28_s27 = sadd.s32 1, %s4012_s24  ;;  %s4016_s25 = sphi %s4062_s25, %s16_s25   ;;  %s4012_s24 = sphi %s4060_s24, %s4307_s24   ;;  %s4008_s23 = sphi %s4058_s23, %s4306_s23   ;;  %s4004_s22 = sphi %s4056_s22, %s4305_s22   ;;  %s4000_s21 = sphi %s4054_s21, %s4304_s21  }
   0x4   : > { %p26_p0 = scmp.ge.s32.totalorder %s25_s26, 2  ;;  %p3241_p1 = scmp.ge.s32.totalorder %s4016_s25, 1 }
   0x5   : > { %p278_p2 = scmp.lt.s32.totalorder %s4016_s25, 11 }
   0x6   : > { %s4309_s26 = smov (%p26_p0, %s25_s26), 0  ;;  %s4311_s27 = smov (!%p26_p0, %s28_s27), %s4012_s24 }
   0x7   : > { %p279_p3 = pnand %p3241_p1, %p278_p2  ;;  %p30_p4 = scmp.ge.s32.totalorder %s4311_s27, 5 }
   0x8   : > { %p342_p5 = scmp.lt.s32.totalorder (!%p279_p3), %s4004_s22, 4  ;;  %p337_p6 = scmp.lt.s32.totalorder (!%p279_p3), %s4000_s21, 1  ;;  %vm400_vm0 = vcmask (!%p279_p3), 130048   ;;  %v911_v30 = vlaneseq (!%p279_p3)  ;;  %v4018_v34 = vmov (!%p279_p3), 0.0   ;;  %vm1988_vm3 = vcmask (!%p279_p3), 326656  }
   0x9   : > { %s4313_s27 = smov (%p30_p4, %s4311_s27), 0  ;;  %282 = sbr.rel (%p279_p3) target bundleno = 1272 (0x4f8), region = 44 }
   0xa   : > { %v912_v31 = vshrl.u32 (!%p279_p3), %v911_v30, 7  ;;  %v915_v33 = vand.u32 (!%p279_p3), 127, %v911_v30  ;;  %vm3085_vm4 = vcmask (!%p279_p3), 64512  }
   0xc   : > { %v913_v32 = vadd.s32 (!%p279_p3), 8, %v912_v31  ;;  %vm916_vm2 = vcmp.eq.s32.totalorder (!%p279_p3), %v912_v31, %v915_v33 }
   0xd   : > { %v4106_v36 = vsel (!%p279_p3), %vm916_vm2, 1.0, %v4018_v34 }
   0xe   : > { %vm917_vm1 = vcmp.eq.s32.totalorder (!%p279_p3), %v913_v32, %v915_v33  ;;  %v927_v37 = vsel (!%p279_p3), %vm400_vm0, %v4106_v36, 0  ;;  %v922_v44 = vsub.f32 (!%p279_p3), 1.0, %v4106_v36 }
   0xf   : > { %v4104_v35 = vsel (!%p279_p3), %vm917_vm1, 1.0, %v4018_v34  ;;  %v1006_v38 = vsub.f32 (!%p279_p3), %v927_v37, %v927_v37 }
  0x10   : > { %s4315_s22 = smov (!%p342_p5, %s4004_s22), 4  ;;  %s4317_s21 = smov (!%p337_p6, %s4000_s21), 1  ;;  %v923_v42 = vsub.f32 1.0, %v4104_v35  ;;  %v930_v45 = vsel %vm400_vm0, %v4104_v35, 0 }
  0x11   : > { %s3271_s28 = sshll.u32 %s4315_s22, 4  ;;  %s3245_s29 = sshll.u32 %s4315_s22, 2  ;;  %v1007_v39 = vand.u32 4294901760, %v1006_v38  ;;  %v1016_v50 = vsub.f32 %v930_v45, %v930_v45 }
  0x12   : > { %s355_s8 = scalar_lea.vmem %s4299_s2, %s3271_s28  ;;  %s3244_s9 = sshll.u32 %s4317_s21, 1 }
  0x13   : > { %v398_v0 = vld [vmem:[%s355_s8] sm:$0xff]  ;;  %v399_v1 = vld [vmem:[%s355_s8 + $0x8] sm:$0xff]  ;;  %s4094_s10 = sadd.s32 %s3245_s29, %s3244_s9  ;;  %v1008_v40 = vsub.f32 %v1006_v38, %v1007_v39  ;;  %v1017_v56 = vand.u32 4294901760, %v1016_v50  ;;  %s3270_s15 = sshll.u32 %s4317_s21, 4 }
  0x14   : > { %v408_v2 = vand.u32 4294901760, %v398_v0  ;;  %v411_v3 = vand.u32 4294901760, %v399_v1  ;;  %s3246_s11 = sshll.u32 %s4094_s10, 3  ;;  %s341_s18 = scalar_lea.vmem %s4297_s0, %s3270_s15 }
  0x15   : > { %s350_s14 = scalar_lea.vmem %s4298_s1, %s3246_s11  ;;  %v1009_v41 = vand.u32 4294901760, %v1008_v40  ;;  %v1018_v61 = vsub.f32 %v1016_v50, %v1017_v56  ;;  %s358_s28 = scalar_lea.vmem %s4300_s3, %s4315_s22 }
  0x16   : > { %v3710_v4 = vpack.c.bf16 %v411_v3, %v408_v2  ;;  %v496_v5 = vsub.f32 %v398_v0, %v408_v2  ;;  %v396_v6 = vld [vmem:[%s350_s14] sm:$0xff]  ;;  %v397_v7 = vld [vmem:[%s350_s14 + $0x8] sm:$0xff]  ;;  %v503_v8 = vsub.f32 %v399_v1, %v411_v3  ;;  %s361_s7 = scalar_lea.vmem %s4301_s4, %s4315_s22  ;;  %s3930_s21 = smul.u32 80, %s4315_s22 }
  0x17   : > { %v402_v9 = vsel %vm400_vm0, %v396_v6, 0  ;;  %v405_v10 = vsel %vm400_vm0, %v397_v7, 0  ;;  %3474 = vmatprep.mubr.f32.mxu1 %v1009_v41  ;;  %v1019_v2 = vand.u32 4294901760, %v1018_v61  ;;  %s375_s14 = scalar_lea.vmem %s4303_s6, %s3246_s11 }
  0x18   : > { %3711 = vmatprep.subr.bf16.mxu0 %v3710_v4  ;;  %v474_v11 = vand.u32 4294901760, %v402_v9  ;;  %v484_v12 = vand.u32 4294901760, %v405_v10  ;;  %v497_v13 = vand.u32 4294901760, %v496_v5  ;;  %v504_v14 = vand.u32 4294901760, %v503_v8  ;;  %s4168_s12 = scalar_lea.vmem %s4302_s5, %s3930_s21 }
  0x19   : > { %3713 = vmatpush3.bf16.msra.mxu0 %v3710_v4  ;;  %v3718_v28 = vpack.c.bf16 %v503_v8, %v496_v5 }
  0x1a   : > { %v475_v15 = vsub.f32 %v402_v9, %v474_v11  ;;  %v485_v16 = vsub.f32 %v405_v10, %v484_v12  ;;  %v498_v17 = vsub.f32 %v496_v5, %v497_v13  ;;  %v505_v18 = vsub.f32 %v503_v8, %v504_v14 }
  0x1b   : > { %v3726_v29 = vpack.c.bf16 %v504_v14, %v497_v13  ;;  %v376_v14 = vld [vmem:[%s341_s18] sm:$0xff] }
  0x1c   : > { %v476_v19 = vand.u32 4294901760, %v475_v15  ;;  %v486_v20 = vand.u32 4294901760, %v485_v16  ;;  %v499_v21 = vand.u32 4294901760, %v498_v17  ;;  %v506_v22 = vand.u32 4294901760, %v505_v18 }
  0x1e   : > { %v477_v23 = vsub.f32 %v475_v15, %v476_v19  ;;  %v487_v24 = vsub.f32 %v485_v16, %v486_v20  ;;  %v3714_v25 = vpack.c.bf16 %v506_v22, %v499_v21 }
  0x20   : > { %v478_v26 = vand.u32 4294901760, %v477_v23  ;;  %v488_v27 = vand.u32 4294901760, %v487_v24  ;;  %3715 = vmatprep.subr.bf16.mxu0 %v3714_v25 }
  0x22   : > { %3432 = vmatprep.mubr.f32.mxu0 %v478_v26 }
  0x23   : > { %3433 = vmatmul.mubr.f32.vlgmr.msra.gmra.mrb[0].mxu0 %v488_v27 }
  0x24   : > { %3717 = vmatpush3.bf16.msra.mxu0 %v3714_v25  ;;  %3439 = vmatprep.mubr.f32.mxu0 %v474_v11 }
  0x25   : > { %3719 = vmatprep.subr.bf16.mxu0 %v3718_v28 }
  0x2b   : > { %3440 = vmatmul.mubr.f32.vlgmr.msra.gmra.mrb[0].mxu0 %v484_v12 }
  0x2c   : > { %3721 = vmatpush3.bf16.msra.mxu0 %v3718_v28  ;;  %3446 = vmatprep.mubr.f32.mxu0 %v475_v15  ;;  %v377_v15 = vld [vmem:[%s341_s18 + $0x8] sm:$0xff] }
  0x2d   : > { %3723 = vmatprep.subr.bf16.mxu0 %v3710_v4 }
  0x33   : > { %3447 = vmatmul.mubr.f32.vlgmr.msra.gmra.mrb[0].mxu0 %v485_v16  ;;  %v3253_v16 = vld [vmem:[%s358_s28] ss:$0 sm:$0xff] }
  0x34   : > { %3725 = vmatpush3.bf16.msra.mxu0 %v3710_v4  ;;  %3453 = vmatprep.mubr.f32.mxu0 %v476_v19  ;;  %v385_v17 = vmul.f32 %v3253_v16, %v376_v14  ;;  %v386_v18 = vmul.f32 %v3253_v16, %v377_v15  ;;  %v3254_v19 = vld [vmem:[%s361_s7] ss:$0 sm:$0xff]  ;;  %v1472_v14 = vld [vmem:[%s4168_s12 + $0x18] sm:$0xff] }
  0x35   : > { %3727 = vmatprep.subr.bf16.mxu0 %v3726_v29 }
  0x36   : > { %v4144_v21 = vadd.f32 %v3254_v19, %v386_v18 }
  0x38   : > { %v1484_v23 = vand.u32 4294901760, %v4144_v21  ;;  %v2540_v15 = vsel %vm1988_vm3, %v4144_v21, 0 }
  0x3a   : > { %v1576_v26 = vsub.f32 %v4144_v21, %v1484_v23 }
  0x3b   : > { %3454 = vmatmul.mubr.f32.vlgmr.msra.gmra.mrb[0].mxu0 %v486_v20  ;;  %v4142_v20 = vadd.f32 %v3254_v19, %v385_v17  ;;  %v2552_v17 = vand.u32 4294901760, %v1472_v14 }
  0x3c   : > { %3729 = vmatpush3.bf16.msra.mxu0 %v3726_v29  ;;  %3460 = vmatprep.mubr.f32.mxu0 %v474_v11  ;;  %v1577_v28 = vand.u32 4294901760, %v1576_v26 }
  0x3d   : > { %3731 = vmatprep.subr.bf16.mxu0 %v3710_v4  ;;  %v1481_v22 = vand.u32 4294901760, %v4142_v20 }
  0x3e   : > { %v1578_v30 = vsub.f32 %v1576_v26, %v1577_v28 }
  0x3f   : > { %v4148_v24 = vpack.c.bf16 %v1484_v23, %v1481_v22  ;;  %v1569_v25 = vsub.f32 %v4142_v20, %v1481_v22  ;;  %v4189_v23 = vand.u32 4294901760, %v2540_v15 }
  0x40   : > { %v1579_v32 = vand.u32 4294901760, %v1578_v30 }
  0x41   : > { %v1570_v27 = vand.u32 4294901760, %v1569_v25  ;;  %v3766_v34 = vpack.c.bf16 %v1576_v26, %v1569_v25  ;;  %v4193_v26 = vsub.f32 %v1472_v14, %v2552_v17  ;;  %v2623_v30 = vsub.f32 %v2540_v15, %v4189_v23 }
  0x43   : > { %3461 = vmatmul.mubr.f32.vlgmr.msra.gmra.mrb[0].mxu0 %v484_v12  ;;  %v1571_v29 = vsub.f32 %v1569_v25, %v1570_v27  ;;  %v3774_v37 = vpack.c.bf16 %v1577_v28, %v1570_v27  ;;  %v1473_v27 = vld [vmem:[%s4168_s12 + $0x20] sm:$0xff] }
  0x44   : > { %3733 = vmatpush3.bf16.msra.mxu0 %v3710_v4  ;;  %3467 = vmatprep.mubr.f32.mxu0 %v474_v11 }
  0x45   : > { %3759 = vmatprep.subr.bf16.mxu0 %v4148_v24  ;;  %v1572_v31 = vand.u32 4294901760, %v1571_v29 }
  0x47   : > { %v3762_v33 = vpack.c.bf16 %v1579_v32, %v1572_v31  ;;  %v2656_v32 = vand.u32 4294901760, %v4193_v26 }
  0x4b   : > { %3468 = vmatmul.mubr.f32.vlgmr.msra.gmra.mrb[0].mxu0 %v484_v12 }
  0x4c   : > { %3761 = vmatpush3.bf16.msra.mxu0 %v4148_v24 }
  0x4d   : > { %3763 = vmatprep.subr.bf16.mxu0 %v3762_v33 }
 0x11e   : > { %v3469_v43 = vpop.f32.mrb[0].mxu0 }
 0x11f   : > { %v910_v46 = vmax.f32 %v3469_v43, 0.0  ;;  %v899_v47 = vpop.f32.mrb[1].mxu0 }
 0x120   : > { %v909_v48 = vmax.f32 %v899_v47, 0.0 }
 0x121   : > { %v925_v49 = vmul.f32 %v923_v42, %v910_v46 }
 0x122   : > { %v924_v51 = vmul.f32 %v922_v44, %v909_v48 }
 0x123   : > { %v936_v52 = vsel %vm400_vm0, %v925_v49, 0 }
 0x124   : > { %v942_v53 = vand.u32 4294901760, %v936_v52  ;;  %v933_v54 = vsel %vm400_vm0, %v924_v51, 0 }
 0x125   : > { %v939_v55 = vand.u32 4294901760, %v933_v54 }
 0x126   : > { %v1034_v57 = vsub.f32 %v936_v52, %v942_v53 }
 0x127   : > { %v3734_v58 = vpack.c.bf16 %v942_v53, %v939_v55  ;;  %v1027_v59 = vsub.f32 %v933_v54, %v939_v55 }
 0x128   : > { %v1035_v60 = vand.u32 4294901760, %v1034_v57 }
 0x129   : > { %3735 = vmatprep.subr.bf16.mxu1 %v3734_v58  ;;  %v1028_v62 = vand.u32 4294901760, %v1027_v59  ;;  %v3742_v5 = vpack.c.bf16 %v1034_v57, %v1027_v59 }
 0x12a   : > { %3737 = vmatpush3.bf16.xpose.msra.mxu1 %v3734_v58  ;;  %v1036_v63 = vsub.f32 %v1034_v57, %v1035_v60 }
 0x12b   : > { %v1029_v0 = vsub.f32 %v1027_v59, %v1028_v62  ;;  %v3750_v6 = vpack.c.bf16 %v1035_v60, %v1028_v62 }
 0x12c   : > { %v1037_v1 = vand.u32 4294901760, %v1036_v63 }
 0x12d   : > { %v1030_v3 = vand.u32 4294901760, %v1029_v0 }
 0x12f   : > { %v3738_v4 = vpack.c.bf16 %v1037_v1, %v1030_v3 }
 0x131   : > { %3475 = vmatmul.mubr.f32.vlgmr.msra.gmra.mrb[0].mxu1 %v1019_v2  ;;  %3739 = vmatprep.subr.bf16.mxu1 %v3738_v4 }
 0x132   : > { %3741 = vmatpush3.bf16.xpose.msra.mxu1 %v3738_v4  ;;  %3481 = vmatprep.mubr.msk.f32.mxu1 %vm400_vm0, %v4106_v36 }
 0x133   : > { %3743 = vmatprep.subr.bf16.mxu1 %v3742_v5 }
 0x139   : > { %3482 = vmatmul.mubr.msk.f32.vlgmr.msra.gmra.mrb[0].mxu1 %vm400_vm0, %v4104_v35 }
 0x13a   : > { %3745 = vmatpush3.bf16.xpose.msra.mxu1 %v3742_v5  ;;  %3488 = vmatprep.mubr.f32.mxu1 %v1006_v38 }
 0x13b   : > { %3747 = vmatprep.subr.bf16.mxu1 %v3734_v58 }
 0x141   : > { %3489 = vmatmul.mubr.f32.vlgmr.msra.gmra.mrb[0].mxu1 %v1016_v50 }
 0x142   : > { %3749 = vmatpush3.bf16.xpose.msra.mxu1 %v3734_v58  ;;  %3495 = vmatprep.mubr.f32.mxu1 %v1007_v39 }
 0x143   : > { %3751 = vmatprep.subr.bf16.mxu1 %v3750_v6 }
 0x149   : > { %3496 = vmatmul.mubr.f32.vlgmr.msra.gmra.mrb[0].mxu1 %v1017_v56 }
 0x14a   : > { %3753 = vmatpush3.bf16.xpose.msra.mxu1 %v3750_v6  ;;  %3502 = vmatprep.mubr.msk.f32.mxu1 %vm400_vm0, %v4106_v36 }
 0x14b   : > { %3755 = vmatprep.subr.bf16.mxu1 %v3734_v58 }
 0x151   : > { %3503 = vmatmul.mubr.msk.f32.vlgmr.msra.gmra.mrb[0].mxu1 %vm400_vm0, %v4104_v35 }
 0x152   : > { %3757 = vmatpush3.bf16.xpose.msra.mxu1 %v3734_v58  ;;  %3509 = vmatprep.mubr.msk.f32.mxu1 %vm400_vm0, %v4106_v36 }
 0x159   : > { %3510 = vmatmul.mubr.msk.f32.vlgmr.msra.gmra.mrb[0].mxu1 %vm400_vm0, %v4104_v35 }
 0x22c   : > { %v3511_v7 = vpop.f32.mrb[0].mxu1 }
 0x22d   : > { %v1441_v8 = vadd.f32 %v3511_v7, %v925_v49  ;;  %v1430_v9 = vpop.f32.mrb[1].mxu1 }
 0x22e   : > { %v1440_v10 = vadd.f32 %v1430_v9, %v924_v51  ;;  %v1470_v9 = vld [vmem:[%s4168_s12 + $0x8] sm:$0xff] }
 0x22f   : > { %v1445_v11 = vsel %vm400_vm0, %v1441_v8, 0.0 }
 0x230   : > { %v1442_v12 = vsel %vm400_vm0, %v1440_v10, 0.0 }
 0x231   : > { %1443 = vadd.xlane.f32.xlu0 %v1442_v12  ;;  %v1448_v13 = vadd.f32 %v1445_v11, %v1442_v12  ;;  %v2546_v12 = vand.u32 4294901760, %v1470_v9 }
 0x233   : > { %v1449_v38 = vrot.slane %v1448_v13, 4  ;;  %v4187_v22 = vsub.f32 %v1470_v9, %v2546_v12 }
 0x235   : > { %1446 = vadd.xlane.f32.xlu0 %v1445_v11  ;;  %v1450_v39 = vadd.f32 %v1449_v38, %v1448_v13  ;;  %v1471_v13 = vld [vmem:[%s4168_s12 + $0x10] sm:$0xff]  ;;  %v2642_v29 = vand.u32 4294901760, %v4187_v22 }
 0x236   : > { %v2549_v16 = vand.u32 4294901760, %v1471_v13 }
 0x237   : > { %v1451_v40 = vrot.slane %v1450_v39, 2  ;;  %v2643_v38 = vsub.f32 %v4187_v22, %v2642_v29 }
 0x238   : > { %v4191_v25 = vsub.f32 %v1471_v13, %v2549_v16 }
 0x239   : > { %v1452_v41 = vadd.f32 %v1451_v40, %v1450_v39  ;;  %v2624_v39 = vand.u32 4294901760, %v2623_v30 }
 0x23a   : > { %v2649_v31 = vand.u32 4294901760, %v4191_v25 }
 0x23b   : > { %v1453_v42 = vrot.slane %v1452_v41, 1 }
 0x23c   : > { %v2650_v40 = vsub.f32 %v4191_v25, %v2649_v31 }
 0x23d   : > { %v1454_v43 = vadd.f32 %v1453_v42, %v1452_v41  ;;  %v2657_v41 = vsub.f32 %v4193_v26, %v2656_v32 }
 0x23f   : > { %v1459_v45 = vadd.f32 1e-10, %v1454_v43 }
 0x2be   : > { %v1444_v44 = vpop.xlane.xlu0 %1443 }
 0x2bf   : > { %v1455_v46 = vadd.f32 1e-10, %v1444_v44  ;;  %v2644_v44 = vand.u32 4294901760, %v2643_v38 }
 0x2c1   : > { %3972 = vrsqrt.f32 %v1455_v46  ;;  %v2651_v46 = vand.u32 4294901760, %v2650_v40 }
 0x2c2   : > { %v1447_v47 = vpop.xlane.xlu0 %1446  ;;  %3974 = vrsqrt.f32 %v1459_v45  ;;  %v2625_v45 = vsub.f32 %v2623_v30, %v2624_v39 }
 0x2c3   : > { %v1456_v48 = vadd.f32 1e-10, %v1447_v47  ;;  %v2658_v47 = vand.u32 4294901760, %v2657_v41 }
 0x2c5   : > { %3976 = vrsqrt.f32 %v1456_v48 }
 0x2cb   : > { %v3973_v49 = vpop.eup %3972 }
 0x2cc   : > { %v1461_v50 = vmul.f32 %v3973_v49, %v1440_v10  ;;  %v3975_v51 = vpop.eup %3974 }
 0x2ce   : > { %v1463_v52 = vmul.f32 %v3975_v51, %v1461_v50  ;;  %v2626_v50 = vand.u32 4294901760, %v2625_v45 }
 0x2cf   : > { %v3977_v53 = vpop.eup %3976 }
 0x2d0   : > { %v1462_v54 = vmul.f32 %v3977_v53, %v1441_v8  ;;  %v1465_v55 = vsub.f32 %v4106_v36, %v1463_v52  ;;  %v1469_v8 = vld [vmem:[%s4168_s12] sm:$0xff] }
 0x2d1   : > { %v2543_v11 = vand.u32 4294901760, %v1469_v8 }
 0x2d2   : > { %v1464_v56 = vmul.f32 %v3975_v51, %v1462_v54  ;;  %v1467_v57 = vsub.f32 %v1465_v55, %v4106_v36  ;;  %v3842_v51 = vpack.c.bf16 %v2658_v47, %v2651_v46  ;;  %v3850_v55 = vpack.c.bf16 %v4193_v26, %v4191_v25 }
 0x2d3   : > { %v4183_v19 = vpack.c.bf16 %v2546_v12, %v2543_v11 }
 0x2d4   : > { %v1466_v58 = vsub.f32 %v4104_v35, %v1464_v56  ;;  %v1475_v59 = vsel %vm400_vm0, %v1467_v57, 0  ;;  %v3866_v57 = vpack.c.bf16 %v2656_v32, %v2649_v31 }
 0x2d5   : > { %v1547_v60 = vand.u32 4294901760, %v1475_v59 }
 0x2d6   : > { %v1468_v61 = vsub.f32 %v1466_v58, %v4104_v35  ;;  %v2537_v35 = vsel %vm1988_vm3, %v4142_v20, 0  ;;  %v4185_v20 = vsub.f32 %v1469_v8, %v2543_v11  ;;  %v3263_v58 = vld [vmem:[%s4168_s12 + $0x28] sm:$0xff] }
 0x2d7   : > { %v1548_v62 = vsub.f32 %v1475_v59, %v1547_v60  ;;  %v4170_v7 = vand.u32 4294901760, %v2537_v35  ;;  %v3264_v59 = vld [vmem:[%s4168_s12 + $0x30] sm:$0xff]  ;;  %v3267_v8 = vld [vmem:[%s4168_s12 + $0x48] sm:$0xff] }
 0x2d8   : > { %v1478_v63 = vsel %vm400_vm0, %v1468_v61, 0  ;;  %v2635_v28 = vand.u32 4294901760, %v4185_v20  ;;  %v3846_v54 = vpack.c.bf16 %v4187_v22, %v4185_v20  ;;  %v1999_v61 = vand.u32 4294901760, %v3264_v59 }
 0x2d9   : > { %v1549_v0 = vand.u32 4294901760, %v1548_v62  ;;  %v1557_v1 = vand.u32 4294901760, %v1478_v63  ;;  %v4175_v10 = vsub.f32 %v2537_v35, %v4170_v7  ;;  %v4258_v11 = vand.u32 4294901760, %v3267_v8 }
 0x2da   : > { %v3862_v56 = vpack.c.bf16 %v2642_v29, %v2635_v28 }
 0x2db   : > { %v1550_v2 = vsub.f32 %v1548_v62, %v1549_v0  ;;  %v1558_v3 = vsub.f32 %v1478_v63, %v1557_v1  ;;  %v2614_v18 = vand.u32 4294901760, %v4175_v10  ;;  %v3265_v63 = vld [vmem:[%s4168_s12 + $0x38] sm:$0xff] }
 0x2dd   : > { %v1551_v4 = vand.u32 4294901760, %v1550_v2  ;;  %v1559_v5 = vand.u32 4294901760, %v1558_v3  ;;  %v2615_v21 = vsub.f32 %v4175_v10, %v2614_v18 }
 0x2df   : > { %3516 = vmatprep.mubr.f32.mxu0 %v1551_v4  ;;  %v1560_v6 = vsub.f32 %v1558_v3, %v1559_v5  ;;  %v2094_v4 = vsub.f32 %v3264_v59, %v1999_v61 }
 0x2e1   : > { %v1561_v36 = vand.u32 4294901760, %v1560_v6 }
 0x2e3   : > { %3517 = vmatmul.mubr.f32.vlgmr.msra.gmra.mrb[2].mxu0 %v1561_v36  ;;  %v2095_v36 = vand.u32 4294901760, %v2094_v4 }
 0x2e4   : > { %3765 = vmatpush3.bf16.msra.mxu0 %v3762_v33  ;;  %3523 = vmatprep.mubr.f32.mxu0 %v1547_v60  ;;  %v4206_v33 = vand.u32 4294901760, %v1473_v27 }
 0x2e5   : > { %3767 = vmatprep.subr.bf16.mxu0 %v3766_v34 }
 0x2e6   : > { %v2662_v42 = vsub.f32 %v1473_v27, %v4206_v33 }
 0x2e8   : > { %v2663_v48 = vand.u32 4294901760, %v2662_v42 }
 0x2ea   : > { %v2664_v52 = vsub.f32 %v2662_v42, %v2663_v48 }
 0x2eb   : > { %3524 = vmatmul.mubr.f32.vlgmr.msra.gmra.mrb[2].mxu0 %v1557_v1 }
 0x2ec   : > { %3769 = vmatpush3.bf16.msra.mxu0 %v3766_v34  ;;  %3530 = vmatprep.mubr.f32.mxu0 %v1548_v62  ;;  %v4208_v34 = vpack.c.bf16 %v2552_v17, %v2549_v16  ;;  %v2665_v53 = vand.u32 4294901760, %v2664_v52 }
 0x2ed   : > { %3771 = vmatprep.subr.bf16.mxu0 %v4148_v24 }
 0x2f3   : > { %3531 = vmatmul.mubr.f32.vlgmr.msra.gmra.mrb[2].mxu0 %v1558_v3 }
 0x2f4   : > { %3773 = vmatpush3.bf16.msra.mxu0 %v4148_v24  ;;  %3537 = vmatprep.mubr.f32.mxu0 %v1549_v0  ;;  %v3266_v0 = vld [vmem:[%s4168_s12 + $0x40] sm:$0xff] }
 0x2f5   : > { %3775 = vmatprep.subr.bf16.mxu0 %v3774_v37  ;;  %v2005_v2 = vand.u32 4294901760, %v3266_v0 }
 0x2fb   : > { %3538 = vmatmul.mubr.f32.vlgmr.msra.gmra.mrb[2].mxu0 %v1559_v5 }
 0x2fc   : > { %3777 = vmatpush3.bf16.msra.mxu0 %v3774_v37  ;;  %3544 = vmatprep.mubr.f32.mxu0 %v1547_v60  ;;  %v2636_v37 = vsub.f32 %v4185_v20, %v2635_v28 }
 0x2fd   : > { %3779 = vmatprep.subr.bf16.mxu0 %v4148_v24 }
 0x2fe   : > { %v2637_v43 = vand.u32 4294901760, %v2636_v37 }
 0x300   : > { %v3838_v49 = vpack.c.bf16 %v2644_v44, %v2637_v43 }
 0x303   : > { %3545 = vmatmul.mubr.f32.vlgmr.msra.gmra.mrb[2].mxu0 %v1557_v1 }
 0x304   : > { %3781 = vmatpush3.bf16.msra.mxu0 %v4148_v24  ;;  %3551 = vmatprep.mubr.f32.mxu0 %v1547_v60  ;;  %v2616_v24 = vand.u32 4294901760, %v2615_v21  ;;  %v1996_v60 = vand.u32 4294901760, %v3263_v58 }
 0x305   : > { %3831 = vmatprep.subr.bf16.mxu0 %v4183_v19 }
 0x306   : > { %v4247_v62 = vpack.c.bf16 %v1999_v61, %v1996_v60  ;;  %v2087_v3 = vsub.f32 %v3263_v58, %v1996_v60 }
 0x308   : > { %3783 = vmatprep.subr.bf16.mxu1 %v4247_v62  ;;  %v2088_v6 = vand.u32 4294901760, %v2087_v3 }
 0x309   : > { %3785 = vmatpush3.bf16.msra.mxu1 %v4247_v62 }
 0x30a   : > { %v2089_v35 = vsub.f32 %v2087_v3, %v2088_v6  ;;  %v3814_v26 = vpack.c.bf16 %v2095_v36, %v2088_v6 }
 0x30b   : > { %3552 = vmatmul.mubr.f32.vlgmr.msra.gmra.mrb[2].mxu0 %v1557_v1  ;;  %v2002_v1 = vand.u32 4294901760, %v3265_v63 }
 0x30c   : > { %3833 = vmatpush3.bf16.msra.mxu0 %v4183_v19  ;;  %3642 = vmatprep.mubr.f32.mxu0 %v2616_v24  ;;  %v2090_v12 = vand.u32 4294901760, %v2089_v35  ;;  %v2115_v24 = vsub.f32 %v3267_v8, %v4258_v11 }
 0x30d   : > { %3835 = vmatprep.subr.bf16.mxu0 %v4208_v34  ;;  %v4253_v5 = vpack.c.bf16 %v2005_v2, %v2002_v1  ;;  %v2101_v9 = vsub.f32 %v3265_v63, %v2002_v1 }
 0x30e   : > { %v2116_v40 = vand.u32 4294901760, %v2115_v24 }
 0x30f   : > { %3787 = vmatprep.subr.bf16.mxu1 %v4253_v5  ;;  %v2102_v14 = vand.u32 4294901760, %v2101_v9 }
 0x310   : > { %3837 = vmatpush3.bf16.msra.mxu0 %v4208_v34  ;;  %3789 = vmatpush3.bf16.msra.mxu1 %v4253_v5  ;;  %v2117_v44 = vsub.f32 %v2115_v24, %v2116_v40 }
 0x311   : > { %3640 = vmatprep.subr.mxu0 %v4206_v33  ;;  %3562 = vmatprep.subr.mxu1 %v4258_v11  ;;  %v2103_v17 = vsub.f32 %v2101_v9, %v2102_v14 }
 0x312   : > { %v2118_v45 = vand.u32 4294901760, %v2117_v44 }
 0x314   : > { %3641 = vmatpush3.msra.mxu0 %v4206_v33  ;;  %3563 = vmatpush3.msra.mxu1 %v4258_v11 }
 0x315   : > { %3839 = vmatprep.subr.bf16.mxu0 %v3838_v49  ;;  %3643 = vmatmul.mubr.f32.vlgmr.msra.gmra.mrb[4].mxu0 %v2626_v50 }
 0x316   : > { %3841 = vmatpush3.bf16.msra.mxu0 %v3838_v49  ;;  %3655 = vmatprep.mubr.f32.mxu0 %v4170_v7 }
 0x317   : > { %3843 = vmatprep.subr.bf16.mxu0 %v3842_v51 }
 0x31a   : > { %3845 = vmatpush3.bf16.msra.mxu0 %v3842_v51 }
 0x31b   : > { %3653 = vmatprep.subr.mxu0 %v2665_v53 }
 0x31e   : > { %3654 = vmatpush3.msra.mxu0 %v2665_v53 }
 0x31f   : > { %3847 = vmatprep.subr.bf16.mxu0 %v3846_v54  ;;  %3656 = vmatmul.mubr.f32.vlgmr.msra.gmra.mrb[4].mxu0 %v4189_v23 }
 0x320   : > { %3849 = vmatpush3.bf16.msra.mxu0 %v3846_v54  ;;  %3668 = vmatprep.mubr.f32.mxu0 %v4175_v10  ;;  %v2108_v10 = vsub.f32 %v3266_v0, %v2005_v2 }
 0x321   : > { %3851 = vmatprep.subr.bf16.mxu0 %v3850_v55 }
 0x322   : > { %v2109_v15 = vand.u32 4294901760, %v2108_v10  ;;  %v3802_v25 = vpack.c.bf16 %v2108_v10, %v2101_v9 }
 0x324   : > { %3853 = vmatpush3.bf16.msra.mxu0 %v3850_v55  ;;  %v3818_v21 = vpack.c.bf16 %v2109_v15, %v2102_v14 }
 0x325   : > { %3666 = vmatprep.subr.mxu0 %v2662_v42 }
 0x328   : > { %3667 = vmatpush3.msra.mxu0 %v2662_v42 }
 0x329   : > { %3855 = vmatprep.subr.bf16.mxu0 %v4183_v19  ;;  %3669 = vmatmul.mubr.f32.vlgmr.msra.gmra.mrb[4].mxu0 %v2623_v30 }
 0x32a   : > { %3857 = vmatpush3.bf16.msra.mxu0 %v4183_v19  ;;  %3681 = vmatprep.mubr.f32.mxu0 %v2614_v18  ;;  %v2110_v18 = vsub.f32 %v2108_v10, %v2109_v15 }
 0x32b   : > { %3859 = vmatprep.subr.bf16.mxu0 %v4208_v34 }
 0x32c   : > { %v2111_v20 = vand.u32 4294901760, %v2110_v18 }
 0x32e   : > { %3861 = vmatpush3.bf16.msra.mxu0 %v4208_v34 }
 0x32f   : > { %3679 = vmatprep.subr.mxu0 %v4206_v33 }
 0x332   : > { %3680 = vmatpush3.msra.mxu0 %v4206_v33 }
 0x333   : > { %3863 = vmatprep.subr.bf16.mxu0 %v3862_v56  ;;  %3682 = vmatmul.mubr.f32.vlgmr.msra.gmra.mrb[4].mxu0 %v2624_v39 }
 0x334   : > { %3865 = vmatpush3.bf16.msra.mxu0 %v3862_v56  ;;  %3694 = vmatprep.mubr.f32.mxu0 %v4170_v7 }
 0x335   : > { %3867 = vmatprep.subr.bf16.mxu0 %v3866_v57 }
 0x338   : > { %3869 = vmatpush3.bf16.msra.mxu0 %v3866_v57 }
 0x339   : > { %3692 = vmatprep.subr.mxu0 %v2663_v48 }
 0x33c   : > { %3693 = vmatpush3.msra.mxu0 %v2663_v48 }
 0x33d   : > { %3871 = vmatprep.subr.bf16.mxu0 %v4183_v19  ;;  %3695 = vmatmul.mubr.f32.vlgmr.msra.gmra.mrb[4].mxu0 %v4189_v23 }
 0x33e   : > { %3873 = vmatpush3.bf16.msra.mxu0 %v4183_v19  ;;  %3707 = vmatprep.mubr.f32.mxu0 %v4170_v7  ;;  %v2096_v7 = vsub.f32 %v2094_v4, %v2095_v36  ;;  %v2104_v19 = vand.u32 4294901760, %v2103_v17 }
 0x33f   : > { %3875 = vmatprep.subr.bf16.mxu0 %v4208_v34 }
 0x340   : > { %v2097_v13 = vand.u32 4294901760, %v2096_v7  ;;  %v3794_v22 = vpack.c.bf16 %v2111_v20, %v2104_v19 }
 0x342   : > { %3877 = vmatpush3.bf16.msra.mxu0 %v4208_v34  ;;  %v3790_v16 = vpack.c.bf16 %v2097_v13, %v2090_v12 }
 0x343   : > { %3705 = vmatprep.subr.mxu0 %v4206_v33 }
 0x344   : > { %3791 = vmatprep.subr.bf16.mxu1 %v3790_v16 }
 0x346   : > { %3706 = vmatpush3.msra.mxu0 %v4206_v33 }
 0x347   : > { %3708 = vmatmul.mubr.f32.vlgmr.msra.gmra.mrb[4].mxu0 %v4189_v23  ;;  %v3798_v23 = vpack.c.bf16 %v2094_v4, %v2087_v3 }
 0x3de   : > { %v3553_v27 = vpop.f32.mrb[2].mxu0 }
 0x3df   : > { %v1993_v28 = vsel %vm1988_vm3, %v3553_v27, 0  ;;  %v1972_v29 = vpop.f32.mrb[3].mxu0 }
 0x3e0   : > { %v2075_v30 = vand.u32 4294901760, %v1993_v28  ;;  %v1990_v31 = vsel %vm1988_vm3, %v1972_v29, 0 }
 0x3e1   : > { %v2065_v32 = vand.u32 4294901760, %v1990_v31 }
 0x3e2   : > { %v2076_v33 = vsub.f32 %v1993_v28, %v2075_v30 }
 0x3e3   : > { %v2066_v34 = vsub.f32 %v1990_v31, %v2065_v32 }
 0x3e4   : > { %v2077_v37 = vand.u32 4294901760, %v2076_v33 }
 0x3e5   : > { %v2067_v38 = vand.u32 4294901760, %v2066_v34 }
 0x3e6   : > { %v2078_v39 = vsub.f32 %v2076_v33, %v2077_v37 }
 0x3e7   : > { %v2068_v41 = vsub.f32 %v2066_v34, %v2067_v38 }
 0x3e8   : > { %v2079_v43 = vand.u32 4294901760, %v2078_v39 }
 0x3e9   : > { %v2069_v42 = vand.u32 4294901760, %v2068_v41 }
 0x3eb   : > { %3564 = vmatprep.mubr.f32.mxu1 %v2069_v42 }
 0x3ec   : > { %3565 = vmatmul.mubr.f32.vlgmr.msra.gmra.mrb[2].mxu1 %v2079_v43 }
 0x3ed   : > { %3793 = vmatpush3.bf16.msra.mxu1 %v3790_v16  ;;  %3577 = vmatprep.mubr.f32.mxu1 %v2065_v32 }
 0x3ee   : > { %3795 = vmatprep.subr.bf16.mxu1 %v3794_v22 }
 0x3f1   : > { %3797 = vmatpush3.bf16.msra.mxu1 %v3794_v22 }
 0x3f2   : > { %3575 = vmatprep.subr.mxu1 %v2118_v45 }
 0x3f5   : > { %3576 = vmatpush3.msra.mxu1 %v2118_v45 }
 0x3f6   : > { %3578 = vmatmul.mubr.f32.vlgmr.msra.gmra.mrb[2].mxu1 %v2075_v30  ;;  %3799 = vmatprep.subr.bf16.mxu1 %v3798_v23 }
 0x3f7   : > { %3801 = vmatpush3.bf16.msra.mxu1 %v3798_v23  ;;  %3590 = vmatprep.mubr.f32.mxu1 %v2066_v34 }
 0x3f8   : > { %3803 = vmatprep.subr.bf16.mxu1 %v3802_v25 }
 0x3fb   : > { %3805 = vmatpush3.bf16.msra.mxu1 %v3802_v25 }
 0x3fc   : > { %3588 = vmatprep.subr.mxu1 %v2115_v24 }
 0x3ff   : > { %3589 = vmatpush3.msra.mxu1 %v2115_v24 }
 0x400   : > { %3591 = vmatmul.mubr.f32.vlgmr.msra.gmra.mrb[2].mxu1 %v2076_v33  ;;  %3807 = vmatprep.subr.bf16.mxu1 %v4247_v62 }
 0x401   : > { %3809 = vmatpush3.bf16.msra.mxu1 %v4247_v62  ;;  %3603 = vmatprep.mubr.f32.mxu1 %v2067_v38 }
 0x402   : > { %3811 = vmatprep.subr.bf16.mxu1 %v4253_v5 }
 0x405   : > { %3813 = vmatpush3.bf16.msra.mxu1 %v4253_v5 }
 0x406   : > { %3601 = vmatprep.subr.mxu1 %v4258_v11 }
 0x409   : > { %3602 = vmatpush3.msra.mxu1 %v4258_v11 }
 0x40a   : > { %3604 = vmatmul.mubr.f32.vlgmr.msra.gmra.mrb[2].mxu1 %v2077_v37  ;;  %3815 = vmatprep.subr.bf16.mxu1 %v3814_v26 }
 0x40b   : > { %3817 = vmatpush3.bf16.msra.mxu1 %v3814_v26  ;;  %3616 = vmatprep.mubr.f32.mxu1 %v2065_v32 }
 0x40c   : > { %3819 = vmatprep.subr.bf16.mxu1 %v3818_v21 }
 0x40f   : > { %3821 = vmatpush3.bf16.msra.mxu1 %v3818_v21 }
 0x410   : > { %3614 = vmatprep.subr.mxu1 %v2116_v40 }
 0x413   : > { %3615 = vmatpush3.msra.mxu1 %v2116_v40 }
 0x414   : > { %3617 = vmatmul.mubr.f32.vlgmr.msra.gmra.mrb[2].mxu1 %v2075_v30  ;;  %3823 = vmatprep.subr.bf16.mxu1 %v4247_v62 }
 0x415   : > { %3825 = vmatpush3.bf16.msra.mxu1 %v4247_v62  ;;  %3629 = vmatprep.mubr.f32.mxu1 %v2065_v32 }
 0x416   : > { %3827 = vmatprep.subr.bf16.mxu1 %v4253_v5 }
 0x419   : > { %3829 = vmatpush3.bf16.msra.mxu1 %v4253_v5 }
 0x41a   : > { %3627 = vmatprep.subr.mxu1 %v4258_v11  ;;  %v3709_v46 = vpop.f32.mrb[4].mxu0 }
 0x41b   : > { %v3073_v47 = vpop.f32.mrb[5].mxu0 }
 0x41d   : > { %3628 = vmatpush3.msra.mxu1 %v4258_v11 }
 0x41e   : > { %3630 = vmatmul.mubr.f32.vlgmr.msra.gmra.mrb[2].mxu1 %v2075_v30 }
 0x4f1   : > { %v3631_v48 = vpop.f32.mrb[2].mxu1 }
 0x4f2   : > { %v3878_v49 = vadd.f32 %v3709_v46, %v3631_v48  ;;  %v2526_v50 = vpop.f32.mrb[3].mxu1 }
 0x4f3   : > { %v3879_v51 = vadd.f32 %v3073_v47, %v2526_v50 }
 0x4f4   : > { %v3084_v52 = vmax.f32 %v3878_v49, 0.0 }
 0x4f5   : > { %v3083_v53 = vmax.f32 %v3879_v51, 0.0 }
 0x4f6   : > { %3087 = vst.msk [vmem:[%s375_s14 + $0x8] sm:$0xff] %vm3085_vm4, %v3084_v52 }
 0x4f7   : > { %3086 = vst.msk [vmem:[%s375_s14] sm:$0xff] %vm3085_vm4, %v3083_v53 }
 0x4f8 PF: > { %s16_s25 = sadd.s32 1, %s4016_s25   ;;  %s4304_s21 = smov %s4008_s23 }
 0x4f9   : > { %p13_p7 = scmp.ge.s32.totalorder %s16_s25, 12   ;;  %s4305_s22 = smov %s4012_s24 }
 0x4fa   : > { %s4306_s23 = smov %s4309_s26  ;;  %s4307_s24 = smov %s4313_s27 }
 0x4fb   :  { %15 = sbr.rel (!%p13_p7) target bundleno = 3 (0x3), region = 90 }

// kernel: feature_extractor_forward.2
= control target key start
LH: loop header
LB: loop body
LE: loop exit
PB: predicated region body
PF: predicated region fallthrough
CT: control target
= control target key end

     0   :  { %s3925_s17 = smov 0   ;;  %s4142_s0 = inlined_call_operand.vmem [shape: f32[2,16,40], index: 0, kind: input, shape index: {}]   ;;  %s4143_s1 = inlined_call_operand.vmem [shape: f32[40,5], index: 1, kind: input, shape index: {}]   ;;  %s4144_s2 = inlined_call_operand.vmem [shape: f32[5,40], index: 2, kind: input, shape index: {}]   ;;  %s4145_s3 = inlined_call_operand.vmem [shape: f32[5,2], index: 3, kind: input, shape index: {}]   ;;  %s4146_s4 = inlined_call_operand.vmem [shape: f32[1,2], index: 4, kind: input, shape index: {}]   ;;  %s4147_s5 = inlined_call_operand.vmem [shape: f32[2,5], index: 5, kind: input, shape index: {}]   ;;  %s4148_s6 = inlined_call_operand.vmem [shape: f32[1,5], index: 6, kind: input, shape index: {}]   ;;  %s4149_s7 = inlined_call_operand.vmem [shape: f32[4,16], index: 7, kind: input, shape index: {}]   ;;  %s4150_s8 = inlined_call_operand.vmem [shape: f32[4,1], index: 8, kind: input, shape index: {}]   ;;  %s4151_s9 = inlined_call_operand.vmem [shape: f32[16,4], index: 9, kind: input, shape index: {}]   ;;  %s4152_s10 = inlined_call_operand.vmem [shape: f32[16,1], index: 10, kind: input, shape index: {}]   ;;  %s4153_s11 = inlined_call_operand.vmem [shape: f32[2,16,40], index: 11, kind: output, shape index: {}]  }
   0x1 LB: > { %s3345_s18 = sadd.s32 4294967295, %s3859_s17   ;;  %p3349_p0 = scmp.ge.s32.totalorder %s3859_s17, 1  ;;  %s3859_s17 = sphi %s3925_s17, %s21_s17  }
   0x2   : > { %p337_p1 = scmp.lt.s32.totalorder %s3859_s17, 3 }
   0x4   : > { %p338_p2 = pnand %p3349_p0, %p337_p1 }
   0x5   : > { %v401_v0 = vld [vmem:[%s4143_s1] sm:$0xff] (!%p338_p2)  ;;  %v402_v1 = vld [vmem:[%s4143_s1 + $0x8] sm:$0xff] (!%p338_p2)  ;;  %v403_v2 = vld [vmem:[%s4143_s1 + $0x10] sm:$0xff] (!%p338_p2)  ;;  %v3861_v3 = vmov (!%p338_p2), 0.0|0.0   ;;  %vm3862_vm0 = vmmov (!%p338_p2), 0   ;;  %v3863_v8 = vmov (!%p338_p2), 0.0  }
   0x6   : > { %341 = sbr.rel (%p338_p2) target bundleno = 1949 (0x79d), region = 64  ;;  %3709 = vmatprep.subr.bf16.mxu0 (!%p338_p2), %v3861_v3  ;;  %v410_v4 = vand.u32 (!%p338_p2), 4294901760, %v401_v0  ;;  %v413_v5 = vand.u32 (!%p338_p2), 4294901760, %v402_v1  ;;  %v404_v6 = vld [vmem:[%s4143_s1 + $0x18] sm:$0xff] (!%p338_p2)  ;;  %v416_v7 = vand.u32 (!%p338_p2), 4294901760, %v403_v2  ;;  %3479 = vmatprep.mubr.msk.f32.mxu0 (!%p338_p2), %vm3862_vm0, %v3863_v8  ;;  %p377_p3 = scmp.lt.s32.totalorder (!%p338_p2), %s3345_s18, 1 }
   0x7   : > { %v419_v9 = vand.u32 (!%p338_p2), 4294901760, %v404_v6  ;;  %3552 = vmatprep.subr.mxu1 (!%p338_p2), %v3863_v8  ;;  %3554 = vmatprep.mubr.msk.f32.mxu1 (!%p338_p2), %vm3862_vm0, %v3863_v8  ;;  %vm389_vm1 = vcmask (!%p338_p2), 326656   ;;  %v405_v12 = vld [vmem:[%s4143_s1 + $0x20] sm:$0xff] (!%p338_p2)  ;;  %vm913_vm2 = vcmask (!%p338_p2), 1044480   ;;  %vm909_vm3 = vcmask (!%p338_p2), 39936  }
   0x8   : > { %v3951_v10 = vpack.c.bf16 (!%p338_p2), %v413_v5, %v410_v4  ;;  %v3977_v17 = vand.u32 (!%p338_p2), 4294901760, %v405_v12  ;;  %v491_v22 = vsub.f32 (!%p338_p2), %v401_v0, %v410_v4  ;;  %v498_v23 = vsub.f32 (!%p338_p2), %v402_v1, %v413_v5  ;;  %v907_v58 = vld [vmem:[%s4145_s3] sm:$0x1f] (!%p338_p2) }
   0x9   : > { %v3956_v11 = vpack.c.bf16 (!%p338_p2), %v419_v9, %v416_v7  ;;  %v505_v26 = vsub.f32 (!%p338_p2), %v403_v2, %v416_v7  ;;  %v512_v27 = vsub.f32 (!%p338_p2), %v404_v6, %v419_v9  ;;  %v915_v59 = vsel (!%p338_p2), %vm913_vm2, %v907_v58, 0 }
   0xa   : > { %3711 = vmatpush3.bf16.msra.mxu0 (!%p338_p2), %v3951_v10  ;;  %v492_v29 = vand.u32 (!%p338_p2), 4294901760, %v491_v22  ;;  %v499_v30 = vand.u32 (!%p338_p2), 4294901760, %v498_v23  ;;  %v519_v38 = vsub.f32 (!%p338_p2), %v405_v12, %v3977_v17  ;;  %v3722_v54 = vpack.c.bf16 (!%p338_p2), %v498_v23, %v491_v22 }
   0xb   : > { %3712 = vmatprep.subr.bf16.mxu0 (!%p338_p2), %v3861_v3  ;;  %v506_v32 = vand.u32 (!%p338_p2), 4294901760, %v505_v26  ;;  %v513_v36 = vand.u32 (!%p338_p2), 4294901760, %v512_v27  ;;  %v3725_v55 = vpack.c.bf16 (!%p338_p2), %v512_v27, %v505_v26  ;;  %v918_v60 = vand.u32 (!%p338_p2), 4294901760, %v915_v59 }
   0xc   : > { %v493_v34 = vsub.f32 (!%p338_p2), %v491_v22, %v492_v29  ;;  %v500_v35 = vsub.f32 (!%p338_p2), %v498_v23, %v499_v30  ;;  %v520_v49 = vand.u32 (!%p338_p2), 4294901760, %v519_v38  ;;  %v3734_v56 = vpack.c.bf16 (!%p338_p2), %v499_v30, %v492_v29 }
   0xd   : > { %s4155_s18 = smov (!%p377_p3, %s3345_s18), 1  ;;  %v507_v42 = vsub.f32 %v505_v26, %v506_v32  ;;  %v514_v43 = vsub.f32 %v512_v27, %v513_v36  ;;  %v3737_v57 = vpack.c.bf16 %v513_v36, %v506_v32  ;;  %v995_v61 = vsub.f32 %v915_v59, %v918_v60 }
   0xe   : > { %s3359_s27 = sshll.u32 %s4155_s18, 4  ;;  %3714 = vmatpush3.bf16.msra.mxu0 %v3956_v11  ;;  %v494_v40 = vand.u32 4294901760, %v493_v34  ;;  %v501_v41 = vand.u32 4294901760, %v500_v35  ;;  %v521_v52 = vsub.f32 %v519_v38, %v520_v49  ;;  %vm1370_vm4 = vcmask 1041408   ;;  %v1826_v34 = vld [vmem:[%s4144_s2] sm:$0x1f] }
   0xf   : > { %s381_s13 = scalar_lea.vmem %s4142_s0, %s3359_s27  ;;  %3477 = vmatprep.subr.mxu0 %v3863_v8  ;;  %v508_v47 = vand.u32 4294901760, %v507_v42  ;;  %v515_v48 = vand.u32 4294901760, %v514_v43  ;;  %v996_v62 = vand.u32 4294901760, %v995_v61  ;;  %vm1366_vm5 = vcmask 15360   ;;  %s386_s24 = scalar_lea.vmem %s4153_s11, %s3359_s27 }
  0x10   : > { %v3968_v13 = vld [vmem:[%s381_s13] sm:$0xff]  ;;  %v3970_v14 = vld [vmem:[%s381_s13 + $0x8] sm:$0xff]  ;;  %v3716_v46 = vpack.c.bf16 %v501_v41, %v494_v40  ;;  %v522_v53 = vand.u32 4294901760, %v521_v52  ;;  %v1831_v35 = vsel %vm913_vm2, %v1826_v34, 0  ;;  %vm2296_vm6 = vcmask 130048  }
  0x11   : > { %v390_v15 = vsel %vm389_vm1, %v3968_v13, 0.0  ;;  %v391_v16 = vsel %vm389_vm1, %v3970_v14, 0.0  ;;  %v3719_v51 = vpack.c.bf16 %v515_v48, %v508_v47  ;;  %v997_v63 = vsub.f32 %v995_v61, %v996_v62 }
  0x12   : > { %v392_v18 = vadd.f32 %v391_v16, %v390_v15  ;;  %3478 = vmatpush3.msra.mxu0 %v3977_v17  ;;  %v1834_v36 = vand.u32 4294901760, %v1831_v35  ;;  %vm2764_vm7 = vcmask 31744   ;;  %vm2771_vm8 = vcmask 1043456  }
  0x13   : > { %3715 = vmatprep.subr.bf16.mxu0 %v3861_v3  ;;  %v998_v0 = vand.u32 4294901760, %v997_v63 }
  0x14   : > { %v393_v19 = vrot.slane %v392_v18, 4 }
  0x15   : > { %3553 = vmatpush3.msra.mxu1 %v998_v0 }
  0x16   : > { %v394_v20 = vadd.f32 %v393_v19, %v392_v18  ;;  %3557 = vmatprep.subr.mxu1 %v3863_v8  ;;  %v908_v18 = vld [vmem:[%s4146_s4] sm:$0x1] }
  0x18   : > { %v395_v21 = vrot.slane %v394_v20, 2 }
  0x1a   : > { %v396_v24 = vadd.f32 %v395_v21, %v394_v20 }
  0x1c   : > { %v397_v25 = vrot.slane %v396_v24, 1 }
  0x1e   : > { %v398_v28 = vadd.f32 %v397_v25, %v396_v24 }
  0x20   : > { %v400_v31 = vmul.f32 0.0625, %v398_v28 }
  0x22   : > { %v407_v33 = vsel %vm389_vm1, %v400_v31, 0 }
  0x23   : > { %v479_v37 = vand.u32 4294901760, %v407_v33 }
  0x25   : > { %v480_v39 = vsub.f32 %v407_v33, %v479_v37 }
  0x27   : > { %v481_v44 = vand.u32 4294901760, %v480_v39 }
  0x29   : > { %v482_v45 = vsub.f32 %v480_v39, %v481_v44 }
  0x2b   : > { %v483_v50 = vand.u32 4294901760, %v482_v45 }
  0x2d   : > { %3480 = vmatmul.mubr.f32.vlgmr.msra.gmra.mrb[0].mxu0 %v483_v50 }
  0x2e   : > { %3717 = vmatpush3.bf16.msra.mxu0 %v3716_v46  ;;  %3492 = vmatprep.mubr.msk.f32.mxu0 %vm3862_vm0, %v3863_v8 }
  0x2f   : > { %3718 = vmatprep.subr.bf16.mxu0 %v3861_v3 }
  0x32   : > { %3720 = vmatpush3.bf16.msra.mxu0 %v3719_v51 }
  0x33   : > { %3490 = vmatprep.subr.mxu0 %v3863_v8 }
  0x36   : > { %3491 = vmatpush3.msra.mxu0 %v522_v53 }
  0x37   : > { %3721 = vmatprep.subr.bf16.mxu0 %v3861_v3  ;;  %3493 = vmatmul.mubr.f32.vlgmr.msra.gmra.mrb[0].mxu0 %v479_v37 }
  0x38   : > { %3723 = vmatpush3.bf16.msra.mxu0 %v3722_v54  ;;  %3505 = vmatprep.mubr.msk.f32.mxu0 %vm3862_vm0, %v3863_v8 }
  0x39   : > { %3724 = vmatprep.subr.bf16.mxu0 %v3861_v3 }
  0x3c   : > { %3726 = vmatpush3.bf16.msra.mxu0 %v3725_v55  ;;  %v2279_v55 = vlaneseq }
  0x3d   : > { %3503 = vmatprep.subr.mxu0 %v3863_v8 }
  0x40   : > { %3504 = vmatpush3.msra.mxu0 %v519_v38 }
  0x41   : > { %3727 = vmatprep.subr.bf16.mxu0 %v3861_v3  ;;  %3506 = vmatmul.mubr.f32.vlgmr.msra.gmra.mrb[0].mxu0 %v480_v39 }
  0x42   : > { %3729 = vmatpush3.bf16.msra.mxu0 %v3951_v10  ;;  %3518 = vmatprep.mubr.msk.f32.mxu0 %vm3862_vm0, %v3863_v8 }
  0x43   : > { %3730 = vmatprep.subr.bf16.mxu0 %v3861_v3 }
  0x46   : > { %3732 = vmatpush3.bf16.msra.mxu0 %v3956_v11 }
  0x47   : > { %3516 = vmatprep.subr.mxu0 %v3863_v8 }
  0x4a   : > { %3517 = vmatpush3.msra.mxu0 %v3977_v17 }
  0x4b   : > { %3733 = vmatprep.subr.bf16.mxu0 %v3861_v3  ;;  %3519 = vmatmul.mubr.f32.vlgmr.msra.gmra.mrb[0].mxu0 %v481_v44  ;;  %v1911_v44 = vsub.f32 %v1831_v35, %v1834_v36 }
  0x4c   : > { %3735 = vmatpush3.bf16.msra.mxu0 %v3734_v56  ;;  %3531 = vmatprep.mubr.msk.f32.mxu0 %vm3862_vm0, %v3863_v8  ;;  %v2280_v56 = vshrl.u32 %v2279_v55, 7 }
  0x4d   : > { %3736 = vmatprep.subr.bf16.mxu0 %v3861_v3  ;;  %v1912_v47 = vand.u32 4294901760, %v1911_v44 }
  0x4f   : > { %v1913_v50 = vsub.f32 %v1911_v44, %v1912_v47 }
  0x50   : > { %3738 = vmatpush3.bf16.msra.mxu0 %v3737_v57  ;;  %v2281_v57 = vsub.s32 0, %v2280_v56 }
  0x51   : > { %3529 = vmatprep.subr.mxu0 %v3863_v8  ;;  %v1914_v53 = vand.u32 4294901760, %v1913_v50 }
  0x54   : > { %3530 = vmatpush3.msra.mxu0 %v520_v49 }
  0x55   : > { %3739 = vmatprep.subr.bf16.mxu0 %v3861_v3  ;;  %3532 = vmatmul.mubr.f32.vlgmr.msra.gmra.mrb[0].mxu0 %v479_v37 }
  0x56   : > { %3741 = vmatpush3.bf16.msra.mxu0 %v3951_v10  ;;  %3544 = vmatprep.mubr.msk.f32.mxu0 %vm3862_vm0, %v3863_v8 }
  0x57   : > { %3742 = vmatprep.subr.bf16.mxu0 %v3861_v3 }
  0x5a   : > { %3744 = vmatpush3.bf16.msra.mxu0 %v3956_v11  ;;  %v1364_v11 = vld [vmem:[%s4147_s5] sm:$0x3] }
  0x5b   : > { %3542 = vmatprep.subr.mxu0 %v3863_v8  ;;  %v1372_v12 = vsel %vm1370_vm4, %v1364_v11, 0 }
  0x5c   : > { %v1375_v15 = vand.u32 4294901760, %v1372_v12 }
  0x5e   : > { %3543 = vmatpush3.msra.mxu0 %v3977_v17  ;;  %v1452_v23 = vsub.f32 %v1372_v12, %v1375_v15 }
  0x5f   : > { %3545 = vmatmul.mubr.f32.vlgmr.msra.gmra.mrb[0].mxu0 %v479_v37  ;;  %3547 = vmatprep.subr.mxu0 %v3863_v8  ;;  %v1365_v37 = vld [vmem:[%s4148_s6] sm:$0x1] }
  0x60   : > { %3549 = vmatprep.mubr.msk.f32.mxu0 %vm3862_vm0, %v3863_v8  ;;  %3548 = vmatpush3.msra.mxu0 %v918_v60  ;;  %v1453_v26 = vand.u32 4294901760, %v1452_v23 }
  0x61   : > { %3745 = vmatprep.subr.bf16.mxu0 %v3861_v3 }
  0x62   : > { %v1454_v29 = vsub.f32 %v1452_v23, %v1453_v26 }
  0x64   : > { %v1455_v32 = vand.u32 4294901760, %v1454_v29 }
 0x132   : > { %v903_v1 = vpop.f32.mrb[0].mxu0 }
 0x133   : > { %v911_v2 = vsel %vm909_vm3, %v903_v1, 0  ;;  %v3546_v4 = vpop.f32.mrb[1].mxu0  ;;  %v2294_v1 = vld [vmem:[%s4149_s7] sm:$0xf] }
 0x134   : > { %v983_v5 = vand.u32 4294901760, %v911_v2 }
 0x136   : > { %v984_v6 = vsub.f32 %v911_v2, %v983_v5  ;;  %3555 = vmatmul.mubr.f32.vlgmr.msra.gmra.mrb[0].mxu1 %v983_v5  ;;  %v2298_v2 = vsel %vm2296_vm6, %v2294_v1, 0 }
 0x137   : > { %3558 = vmatpush3.msra.mxu1 %v995_v61  ;;  %3559 = vmatprep.mubr.msk.f32.mxu1 %vm3862_vm0, %v3863_v8  ;;  %v2367_v4 = vand.u32 4294901760, %v2298_v2 }
 0x138   : > { %v985_v7 = vand.u32 4294901760, %v984_v6  ;;  %3562 = vmatprep.subr.mxu1 %v3863_v8 }
 0x13a   : > { %v986_v9 = vsub.f32 %v984_v6, %v985_v7 }
 0x13c   : > { %v987_v10 = vand.u32 4294901760, %v986_v9 }
 0x13e   : > { %3550 = vmatmul.mubr.f32.vlgmr.msra.gmra.mrb[2].mxu0 %v987_v10  ;;  %3560 = vmatmul.mubr.f32.vlgmr.msra.gmra.mrb[0].mxu1 %v984_v6 }
 0x13f   : > { %3563 = vmatpush3.msra.mxu1 %v918_v60  ;;  %3564 = vmatprep.mubr.msk.f32.mxu1 %vm3862_vm0, %v3863_v8 }
 0x140   : > { %3567 = vmatprep.subr.mxu1 %v3863_v8  ;;  %3641 = vmatprep.mubr.msk.f32.mxu0 %vm3862_vm0, %v3863_v8 }
 0x146   : > { %3565 = vmatmul.mubr.f32.vlgmr.msra.gmra.mrb[0].mxu1 %v985_v7 }
 0x147   : > { %3568 = vmatpush3.msra.mxu1 %v996_v62  ;;  %3569 = vmatprep.mubr.msk.f32.mxu1 %vm3862_vm0, %v3863_v8 }
 0x148   : > { %3572 = vmatprep.subr.mxu1 %v3863_v8 }
 0x14e   : > { %3570 = vmatmul.mubr.f32.vlgmr.msra.gmra.mrb[0].mxu1 %v983_v5 }
 0x14f   : > { %3573 = vmatpush3.msra.mxu1 %v918_v60  ;;  %3574 = vmatprep.mubr.msk.f32.mxu1 %vm3862_vm0, %v3863_v8 }
 0x150   : > { %3577 = vmatprep.subr.mxu1 %v3863_v8 }
 0x156   : > { %3575 = vmatmul.mubr.f32.vlgmr.msra.gmra.mrb[0].mxu1 %v983_v5 }
 0x157   : > { %3579 = vmatprep.mubr.msk.f32.mxu1 %vm3862_vm0, %v3863_v8  ;;  %3578 = vmatpush3.msra.mxu1 %v1375_v15 }
 0x158   : > { %3582 = vmatprep.subr.mxu1 %v3863_v8 }
 0x211   : > { %v989_v16 = vpop.f32.mrb[2].mxu0 }
 0x212   : > { %v3551_v17 = vpop.f32.mrb[3].mxu0  ;;  %v990_v19 = vadd.f32 %v989_v16, %v908_v18 }
 0x229   : > { %v1359_v20 = vpop.f32.mrb[0].mxu1 }
 0x22a   : > { %v3764_v21 = vadd.f32 %v1359_v20, %v990_v19  ;;  %v3576_v22 = vpop.f32.mrb[1].mxu1 }
 0x22c   : > { %v1363_v24 = vmax.f32 %v3764_v21, 0.0 }
 0x22e   : > { %v1368_v25 = vsel %vm1366_vm5, %v1363_v24, 0 }
 0x22f   : > { %v1440_v27 = vand.u32 4294901760, %v1368_v25 }
 0x231   : > { %v1441_v28 = vsub.f32 %v1368_v25, %v1440_v27 }
 0x233   : > { %v1442_v30 = vand.u32 4294901760, %v1441_v28 }
 0x235   : > { %v1443_v31 = vsub.f32 %v1441_v28, %v1442_v30 }
 0x237   : > { %v1444_v33 = vand.u32 4294901760, %v1443_v31 }
 0x239   : > { %3580 = vmatmul.mubr.f32.vlgmr.msra.gmra.mrb[2].mxu1 %v1444_v33 }
 0x23a   : > { %3583 = vmatpush3.msra.mxu1 %v1455_v32  ;;  %3584 = vmatprep.mubr.msk.f32.mxu1 %vm3862_vm0, %v3863_v8 }
 0x23b   : > { %3587 = vmatprep.subr.mxu1 %v3863_v8 }
 0x241   : > { %3585 = vmatmul.mubr.f32.vlgmr.msra.gmra.mrb[2].mxu1 %v1440_v27 }
 0x242   : > { %3588 = vmatpush3.msra.mxu1 %v1452_v23  ;;  %3589 = vmatprep.mubr.msk.f32.mxu1 %vm3862_vm0, %v3863_v8 }
 0x243   : > { %3592 = vmatprep.subr.mxu1 %v3863_v8 }
 0x249   : > { %3590 = vmatmul.mubr.f32.vlgmr.msra.gmra.mrb[2].mxu1 %v1441_v28  ;;  %v2760_v28 = vld [vmem:[%s4151_s9] sm:$0xff] }
 0x24a   : > { %3593 = vmatpush3.msra.mxu1 %v1375_v15  ;;  %3594 = vmatprep.mubr.msk.f32.mxu1 %vm3862_vm0, %v3863_v8  ;;  %v2766_v29 = vsel %vm2764_vm7, %v2760_v28, 0 }
 0x24b   : > { %3597 = vmatprep.subr.mxu1 %v3863_v8 }
 0x251   : > { %3595 = vmatmul.mubr.f32.vlgmr.msra.gmra.mrb[2].mxu1 %v1442_v30  ;;  %v2841_v30 = vand.u32 4294901760, %v2766_v29 }
 0x252   : > { %3598 = vmatpush3.msra.mxu1 %v1453_v26  ;;  %3599 = vmatprep.mubr.msk.f32.mxu1 %vm3862_vm0, %v3863_v8 }
 0x253   : > { %3602 = vmatprep.subr.mxu1 %v3863_v8  ;;  %v2842_v31 = vsub.f32 %v2766_v29, %v2841_v30 }
 0x255   : > { %v2843_v32 = vand.u32 4294901760, %v2842_v31 }
 0x257   : > { %v2844_v33 = vsub.f32 %v2842_v31, %v2843_v32 }
 0x259   : > { %3600 = vmatmul.mubr.f32.vlgmr.msra.gmra.mrb[2].mxu1 %v1440_v27  ;;  %v2845_v34 = vand.u32 4294901760, %v2844_v33 }
 0x25a   : > { %3603 = vmatpush3.msra.mxu1 %v1375_v15  ;;  %3604 = vmatprep.mubr.msk.f32.mxu1 %vm3862_vm0, %v3863_v8 }
 0x25b   : > { %3607 = vmatprep.subr.mxu1 %v3863_v8 }
 0x261   : > { %3605 = vmatmul.mubr.f32.vlgmr.msra.gmra.mrb[2].mxu1 %v1440_v27 }
 0x262   : > { %3609 = vmatprep.mubr.msk.f32.mxu1 %vm3862_vm0, %v3863_v8  ;;  %3608 = vmatpush3.msra.mxu1 %v1834_v36 }
 0x263   : > { %3612 = vmatprep.subr.mxu1 %v3863_v8 }
 0x334   : > { %v1816_v38 = vpop.f32.mrb[2].mxu1 }
 0x335   : > { %v3765_v39 = vadd.f32 %v1816_v38, %v1365_v37  ;;  %v3606_v40 = vpop.f32.mrb[3].mxu1  ;;  %v2295_v37 = vld [vmem:[%s4150_s8] sm:$0xf] }
 0x337   : > { %v3354_v41 = vmul.f32 -1.442695, %v3765_v39 }
 0x339   : > { %3841 = vpow2.f32 %v3354_v41 }
 0x343   : > { %v3842_v42 = vpop.eup %3841 }
 0x344   : > { %v1823_v43 = vadd.f32 1.0, %v3842_v42 }
 0x346   : > { %3843 = vrcp.f32 %v1823_v43 }
 0x350   : > { %v3844_v45 = vpop.eup %3843 }
 0x351   : > { %v1828_v46 = vsel %vm909_vm3, %v3844_v45, 0 }
 0x352   : > { %v1899_v48 = vand.u32 4294901760, %v1828_v46 }
 0x354   : > { %v1900_v49 = vsub.f32 %v1828_v46, %v1899_v48 }
 0x356   : > { %v1901_v51 = vand.u32 4294901760, %v1900_v49 }
 0x358   : > { %v1902_v52 = vsub.f32 %v1900_v49, %v1901_v51 }
 0x35a   : > { %v1903_v54 = vand.u32 4294901760, %v1902_v52  ;;  %v2763_v52 = vld [vmem:[%s4152_s10 + $0x8] sm:$0xff] }
 0x35c   : > { %3610 = vmatmul.mubr.f32.vlgmr.msra.gmra.mrb[4].mxu1 %v1903_v54 }
 0x35d   : > { %3613 = vmatpush3.msra.mxu1 %v1914_v53  ;;  %3614 = vmatprep.mubr.msk.f32.mxu1 %vm3862_vm0, %v3863_v8  ;;  %v2762_v53 = vld [vmem:[%s4152_s10] sm:$0xff] }
 0x35e   : > { %3617 = vmatprep.subr.mxu1 %v3863_v8 }
 0x364   : > { %3615 = vmatmul.mubr.f32.vlgmr.msra.gmra.mrb[4].mxu1 %v1899_v48 }
 0x365   : > { %3618 = vmatpush3.msra.mxu1 %v1911_v44  ;;  %3619 = vmatprep.mubr.msk.f32.mxu1 %vm3862_vm0, %v3863_v8 }
 0x366   : > { %3622 = vmatprep.subr.mxu1 %v3863_v8 }
 0x36c   : > { %3620 = vmatmul.mubr.f32.vlgmr.msra.gmra.mrb[4].mxu1 %v1900_v49 }
 0x36d   : > { %3623 = vmatpush3.msra.mxu1 %v1834_v36  ;;  %3624 = vmatprep.mubr.msk.f32.mxu1 %vm3862_vm0, %v3863_v8 }
 0x36e   : > { %3627 = vmatprep.subr.mxu1 %v3863_v8 }
 0x374   : > { %3625 = vmatmul.mubr.f32.vlgmr.msra.gmra.mrb[4].mxu1 %v1901_v51  ;;  %v3864_v51 = vmov 0  }
 0x375   : > { %3628 = vmatpush3.msra.mxu1 %v1912_v47  ;;  %3629 = vmatprep.mubr.msk.f32.mxu1 %vm3862_vm0, %v3863_v8 }
 0x376   : > { %3632 = vmatprep.subr.mxu1 %v3863_v8  ;;  %3839 = vset.pattern.permute.xlu1 %v3864_v51 }
 0x377   : > { %3840 = vset.pattern.permute.xlu0 %v3864_v51 }
 0x37c   : > { %3630 = vmatmul.mubr.f32.vlgmr.msra.gmra.mrb[4].mxu1 %v1899_v48 }
 0x37d   : > { %3633 = vmatpush3.msra.mxu1 %v1834_v36  ;;  %3634 = vmatprep.mubr.msk.f32.mxu1 %vm3862_vm0, %v3863_v8 }
 0x384   : > { %3635 = vmatmul.mubr.f32.vlgmr.msra.gmra.mrb[4].mxu1 %v1899_v48 }
 0x385   : > { %3681 = vmatprep.mubr.f32.mxu1 %v2845_v34 }
 0x457   : > { %v2275_v58 = vpop.f32.mrb[4].mxu1 }
 0x458   : > { %v2282_v59 = vrot.slane %v2275_v58, %v2281_v57  ;;  %v3636_v60 = vpop.f32.mrb[5].mxu1 }
 0x45a   : > { %v4088_v61 = vmul.f32 %v2282_v59, %v3968_v13  ;;  %v4093_v63 = vmul.f32 %v2282_v59, %v3970_v14  ;;  %v2368_v13 = vsub.f32 %v2298_v2, %v2367_v4 }
 0x45c   : > { %v2285_v62 = vsel %vm389_vm1, %v4088_v61, 0.0  ;;  %v2288_v0 = vsel %vm389_vm1, %v4093_v63, 0.0  ;;  %v2369_v7 = vand.u32 4294901760, %v2368_v13 }
 0x45d   : > { %2286 = vadd.xlane.f32.xlu0 %v2285_v62 }
 0x45e   : > { %v2370_v12 = vsub.f32 %v2368_v13, %v2369_v7 }
 0x460   : > { %v2371_v19 = vand.u32 4294901760, %v2370_v12 }
 0x461   : > { %2289 = vadd.xlane.f32.xlu0 %v2288_v0 }
 0x4ea   : > { %v2287_v5 = vpop.xlane.xlu0 %2286 }
 0x4eb   : > { %v2292_v6 = vmul.f32 0.025, %v2287_v5 }
 0x4ed   : > { %v2301_v9 = vand.u32 4294901760, %v2292_v6 }
 0x4ee   : > { %v2290_v10 = vpop.xlane.xlu0 %2289 }
 0x4ef   : > { %v2379_v14 = vsub.f32 %v2292_v6, %v2301_v9  ;;  %v2293_v11 = vmul.f32 0.025, %v2290_v10 }
 0x4f1   : > { %v2380_v15 = vand.u32 4294901760, %v2379_v14  ;;  %v2304_v16 = vand.u32 4294901760, %v2293_v11 }
 0x4f3   : > { %v3746_v17 = vpack.c.bf16 %v2304_v16, %v2301_v9  ;;  %v2386_v18 = vsub.f32 %v2293_v11, %v2304_v16  ;;  %v2381_v20 = vsub.f32 %v2379_v14, %v2380_v15 }
 0x4f5   : > { %v2387_v21 = vand.u32 4294901760, %v2386_v18  ;;  %3747 = vmatpush3.bf16.msra.mxu0 %v3746_v17  ;;  %v2382_v23 = vand.u32 4294901760, %v2381_v20  ;;  %v3752_v26 = vpack.c.bf16 %v2386_v18, %v2379_v14 }
 0x4f6   : > { %3748 = vmatprep.subr.bf16.mxu0 %v3861_v3 }
 0x4f7   : > { %v2388_v22 = vsub.f32 %v2386_v18, %v2387_v21  ;;  %v3758_v27 = vpack.c.bf16 %v2387_v21, %v2380_v15 }
 0x4f8   : > { %3642 = vmatmul.mubr.f32.vlgmr.msra.gmra.mrb[4].mxu0 %v2371_v19 }
 0x4f9   : > { %v2389_v24 = vand.u32 4294901760, %v2388_v22  ;;  %3648 = vmatprep.mubr.msk.f32.mxu0 %vm3862_vm0, %v3863_v8 }
 0x4fb   : > { %v3749_v25 = vpack.c.bf16 %v2389_v24, %v2382_v23 }
 0x4fd   : > { %3750 = vmatpush3.bf16.msra.mxu0 %v3749_v25 }
 0x4fe   : > { %3751 = vmatprep.subr.bf16.mxu0 %v3861_v3 }
 0x500   : > { %3649 = vmatmul.mubr.f32.vlgmr.msra.gmra.mrb[4].mxu0 %v2367_v4 }
 0x501   : > { %3753 = vmatpush3.bf16.msra.mxu0 %v3752_v26  ;;  %3655 = vmatprep.mubr.msk.f32.mxu0 %vm3862_vm0, %v3863_v8 }
 0x502   : > { %3754 = vmatprep.subr.bf16.mxu0 %v3861_v3 }
 0x508   : > { %3656 = vmatmul.mubr.f32.vlgmr.msra.gmra.mrb[4].mxu0 %v2368_v13 }
 0x509   : > { %3756 = vmatpush3.bf16.msra.mxu0 %v3746_v17  ;;  %3662 = vmatprep.mubr.msk.f32.mxu0 %vm3862_vm0, %v3863_v8 }
 0x50a   : > { %3757 = vmatprep.subr.bf16.mxu0 %v3861_v3 }
 0x510   : > { %3663 = vmatmul.mubr.f32.vlgmr.msra.gmra.mrb[4].mxu0 %v2369_v7 }
 0x511   : > { %3759 = vmatpush3.bf16.msra.mxu0 %v3758_v27  ;;  %3669 = vmatprep.mubr.msk.f32.mxu0 %vm3862_vm0, %v3863_v8 }
 0x512   : > { %3760 = vmatprep.subr.bf16.mxu0 %v3861_v3  ;;  %v2761_v3 = vld [vmem:[%s4151_s9 + $0x8] sm:$0xff] }
 0x513   : > { %v2769_v35 = vsel %vm2764_vm7, %v2761_v3, 0 }
 0x514   : > { %v2851_v36 = vand.u32 4294901760, %v2769_v35 }
 0x518   : > { %3670 = vmatmul.mubr.f32.vlgmr.msra.gmra.mrb[4].mxu0 %v2367_v4 }
 0x519   : > { %3762 = vmatpush3.bf16.msra.mxu0 %v3746_v17  ;;  %3676 = vmatprep.mubr.msk.f32.mxu0 %vm3862_vm0, %v3863_v8  ;;  %v2852_v8 = vsub.f32 %v2769_v35, %v2851_v36 }
 0x51b   : > { %v2853_v38 = vand.u32 4294901760, %v2852_v8 }
 0x51d   : > { %v2854_v42 = vsub.f32 %v2852_v8, %v2853_v38 }
 0x51f   : > { %v2855_v46 = vand.u32 4294901760, %v2854_v42 }
 0x520   : > { %3677 = vmatmul.mubr.f32.vlgmr.msra.gmra.mrb[4].mxu0 %v2367_v4 }
 0x5f3   : > { %v2755_v39 = vpop.f32.mrb[4].mxu0 }
 0x5f4   : > { %v3766_v40 = vadd.f32 %v2755_v39, %v2295_v37  ;;  %v3678_v41 = vpop.f32.mrb[5].mxu0 }
 0x5f6   : > { %v2759_v43 = vmax.f32 %v3766_v40, 0.0 }
 0x5f8   : > { %v2773_v44 = vsel %vm2771_vm8, %v2759_v43, 0 }
 0x5f9   : > { %v2776_v45 = vand.u32 4294901760, %v2773_v44 }
 0x5fb   : > { %v2863_v47 = vsub.f32 %v2773_v44, %v2776_v45  ;;  %3679 = vmatprep.subr.mxu1 %v2776_v45 }
 0x5fc   : > { %3680 = vmatpush3.msra.mxu1 %v2776_v45 }
 0x5fd   : > { %3682 = vmatmul.mubr.f32.vlgmr.msra.gmra.mrb[6].mxu1 %v2855_v46  ;;  %v2864_v48 = vand.u32 4294901760, %v2863_v47 }
 0x5fe   : > { %3686 = vmatprep.mubr.f32.mxu1 %v2841_v30 }
 0x5ff   : > { %v2865_v49 = vsub.f32 %v2863_v47, %v2864_v48 }
 0x601   : > { %v2866_v50 = vand.u32 4294901760, %v2865_v49 }
 0x603   : > { %3684 = vmatprep.subr.mxu1 %v2866_v50 }
 0x604   : > { %3685 = vmatpush3.msra.mxu1 %v2866_v50 }
 0x605   : > { %3687 = vmatmul.mubr.f32.vlgmr.msra.gmra.mrb[6].mxu1 %v2851_v36  ;;  %3689 = vmatprep.subr.mxu1 %v2863_v47 }
 0x606   : > { %3690 = vmatpush3.msra.mxu1 %v2863_v47  ;;  %3691 = vmatprep.mubr.f32.mxu1 %v2842_v31 }
 0x607   : > { %3694 = vmatprep.subr.mxu1 %v2776_v45 }
 0x60d   : > { %3692 = vmatmul.mubr.f32.vlgmr.msra.gmra.mrb[6].mxu1 %v2852_v8 }
 0x60e   : > { %3695 = vmatpush3.msra.mxu1 %v2776_v45  ;;  %3696 = vmatprep.mubr.f32.mxu1 %v2843_v32 }
 0x60f   : > { %3699 = vmatprep.subr.mxu1 %v2864_v48 }
 0x615   : > { %3697 = vmatmul.mubr.f32.vlgmr.msra.gmra.mrb[6].mxu1 %v2853_v38 }
 0x616   : > { %3700 = vmatpush3.msra.mxu1 %v2864_v48  ;;  %3701 = vmatprep.mubr.f32.mxu1 %v2841_v30 }
 0x617   : > { %3704 = vmatprep.subr.mxu1 %v2776_v45 }
 0x61d   : > { %3702 = vmatmul.mubr.f32.vlgmr.msra.gmra.mrb[6].mxu1 %v2851_v36 }
 0x61e   : > { %3705 = vmatpush3.msra.mxu1 %v2776_v45  ;;  %3706 = vmatprep.mubr.f32.mxu1 %v2841_v30 }
 0x625   : > { %3707 = vmatmul.mubr.f32.vlgmr.msra.gmra.mrb[6].mxu1 %v2851_v36 }
 0x6f8   : > { %v3708_v54 = vpop.f32.mrb[6].mxu1 }
 0x6f9   : > { %v3767_v55 = vadd.f32 %v3708_v54, %v2763_v52  ;;  %v3254_v56 = vpop.f32.mrb[7].mxu1 }
 0x6fa   : > { %v3768_v57 = vadd.f32 %v3254_v56, %v2762_v53 }
 0x6fb   : > { %v3356_v58 = vmul.f32 -1.442695, %v3767_v55 }
 0x6fc   : > { %v3355_v59 = vmul.f32 -1.442695, %v3768_v57 }
 0x6fd   : > { %3845 = vpow2.f32 %v3356_v58 }
 0x6fe   : > { %3847 = vpow2.f32 %v3355_v59 }
 0x707   : > { %v3846_v60 = vpop.eup %3845 }
 0x708   : > { %v3848_v62 = vpop.eup %3847  ;;  %v3271_v1 = vadd.f32 1.0, %v3846_v60 }
 0x709   : > { %v3270_v0 = vadd.f32 1.0, %v3848_v62 }
 0x70b   : > { %3849 = vrcp.f32 %v3270_v0 }
 0x70c   : > { %3851 = vrcp.f32 %v3271_v1 }
 0x715   : > { %v3850_v2 = vpop.eup %3849 }
 0x716   : > { %3278 = vperm.xlu1 %3839, %v3850_v2   ;;  %v3852_v4 = vpop.eup %3851 }
 0x71a   : > { %3283 = vperm.xlu1 %3839, %v3852_v4  }
 0x795   : > { %v3279_v13 = vpop.permute.xlu1 %3278 }
 0x796   : > { %v3286_v5 = vmul.f32 %v3279_v13, %v4088_v61 }
 0x798   : > { %3288 = vst.msk [vmem:[%s386_s24] sm:$0xff] %vm389_vm1, %v3286_v5 }
 0x799   : > { %v3284_v6 = vpop.permute.xlu1 %3283 }
 0x79a   : > { %v3287_v7 = vmul.f32 %v3284_v6, %v4093_v63 }
 0x79c   : > { %3289 = vst.msk [vmem:[%s386_s24 + $0x8] sm:$0xff] %vm389_vm1, %v3287_v7 }
 0x79d PF: > { %s21_s17 = sadd.s32 1, %s3859_s17  }
 0x79e   : > { %p18_p4 = scmp.ge.s32.totalorder %s21_s17, 4  }
 0x7a0   :  { %20 = sbr.rel (!%p18_p4) target bundleno = 1 (0x1), region = 94 }

</bundles_post_ra>
